<compile_context>
chip_gen: v7x
topology: tpu7x:2x2x1
jax: 0.10.0
libtpu: 0.0.40
codegen_flags: <defaults>
</compile_context>

<pallas_src>
import functools

import jax
import jax.numpy as jnp
from jax import lax
from jax.experimental import pallas as pl
from jax.experimental.pallas import tpu as pltpu

_HP = 128  # padded hidden / output width (one full lane tile)


# ---------------------------------------------------------------------------
# Fused kernel: hoisted input projection -> unrolled LSTM recurrence ->
# Luong-dot attention -> concat linear + tanh -> output linear + softmax.
# ---------------------------------------------------------------------------
def attn_decoder_kernel(x_ref, hc0_ref, w_lstm_ref, w_heads_ref, b_ref, enc_ref,
                        out_ref, *, T, Bp, Ip, Hp, O):
    # x_ref:      (T*Bp, Ip)     time-major flattened input (B, I zero-padded)
    # hc0_ref:    (Bp, 2Hp)      [h0 | c0]
    # w_lstm_ref: (Ip+Hp, 4Hp)   [w_ih ; w_hh], gate column order (i,f,o,g)
    # w_heads_ref:(3Hp, Hp)      [wc_ctx ; wc_hid ; w_out]
    # b_ref:      (1, 6Hp)       [b_lstm(4Hp) | b_concat(Hp) | b_out(Hp)]
    # enc_ref:    (S, Hp)        squeezed, H-padded encoder outputs
    # out_ref:    (Bp, 3Hp)      [softmax probs | h_final | c_final]
    wih = w_lstm_ref[0:Ip, :]                              # (Ip, 4Hp)
    whh = w_lstm_ref[Ip:Ip + Hp, :]                        # (Hp, 4Hp)
    b_lstm = b_ref[:, 0:4 * Hp]                            # (1, 4Hp)
    b_concat = b_ref[:, 4 * Hp:5 * Hp]                     # (1, Hp)
    b_out = b_ref[:, 5 * Hp:6 * Hp]                        # (1, Hp)

    # Phase 1: input projection for ALL timesteps as one MXU matmul (no
    # sequential dependence), bias folded in once.
    gx = jnp.dot(x_ref[...], wih,
                 preferred_element_type=jnp.float32) + b_lstm      # (T*Bp, 4Hp)

    # Phase 2: recurrence, fully unrolled.  Every slice below is a full
    # 8x128 vreg tile (sublane-/lane-aligned) -> pure VPU/EUP/MXU work.
    h = hc0_ref[:, 0:Hp]                                   # (Bp, Hp)
    c = hc0_ref[:, Hp:2 * Hp]                              # (Bp, Hp)
    for t in range(T):
        gates = gx[t * Bp:(t + 1) * Bp, :] + jnp.dot(
            h, whh, preferred_element_type=jnp.float32)    # (Bp, 4Hp)
        sig = jax.nn.sigmoid(gates[:, 0:3 * Hp])           # (Bp, 3Hp): i,f,o
        i_g = sig[:, 0:Hp]
        f_g = sig[:, Hp:2 * Hp]
        o_g = sig[:, 2 * Hp:3 * Hp]
        g_g = jnp.tanh(gates[:, 3 * Hp:4 * Hp])            # (Bp, Hp)
        c = f_g * c + i_g * g_g
        h = o_g * jnp.tanh(c)
    # TODO(synk): keep whh staged in the MXU across the loop via
    # pltpu.matmul_push_rhs / matmul_acc_lhs / matmul_pop.

    # Phase 3: attention + heads (h stays in vregs; no HBM round-trip).
    enc = enc_ref[...]                                     # (S, Hp)
    # Luong "dot" scores: contract on Hp of both operands (no enc.T copy).
    scores = lax.dot_general(h, enc, (((1,), (1,)), ((), ())),
                             preferred_element_type=jnp.float32)   # (Bp, S)
    scores = scores - jnp.max(scores, axis=1, keepdims=True)
    e = jnp.exp(scores)
    attn_w = e * pl.reciprocal(jnp.sum(e, axis=1, keepdims=True), approx=True)

    # context = attn_weights.mm(encoder_outputs)
    context = jnp.dot(attn_w, enc, preferred_element_type=jnp.float32)  # (Bp, Hp)

    # tanh(Linear(cat([context, h], dim=1))) as ONE MXU matmul.
    cat = jnp.concatenate([context, h], axis=1)            # (Bp, 2Hp)
    concat_out = jnp.tanh(
        jnp.dot(cat, w_heads_ref[0:2 * Hp, :],
                preferred_element_type=jnp.float32) + b_concat)     # (Bp, Hp)

    # softmax(Linear(concat_out), dim=1) with EXACT divide; padded output
    # columns are masked so they contribute 0 to the denominator.
    logits = (jnp.dot(concat_out, w_heads_ref[2 * Hp:3 * Hp, :],
                      preferred_element_type=jnp.float32) + b_out)  # (Bp, Hp)
    col = lax.broadcasted_iota(jnp.int32, logits.shape, 1)
    logits = jnp.where(col < O, logits, jnp.float32(-1e30))
    logits = logits - jnp.max(logits, axis=1, keepdims=True)
    el = jnp.exp(logits)
    probs = el / jnp.sum(el, axis=1, keepdims=True)

    # Single lane-dense output slab [probs | h | c]: three aligned full-vreg
    # stores into one output block -> one unmasked writeback DMA.
    out_ref[:, 0:Hp] = probs
    out_ref[:, Hp:2 * Hp] = h
    out_ref[:, 2 * Hp:3 * Hp] = c


# ---------------------------------------------------------------------------
# Parameter packing (done ONCE, outside the per-call path).
# ---------------------------------------------------------------------------
def _pad_gate_cols(w, H, Hp):
    """Pad the 4H gate columns per-gate: (..., 4H) -> (..., 4Hp)."""
    lead = w.shape[:-1]
    w4 = w.reshape(lead + (4, H))
    pad = [(0, 0)] * (len(lead) + 1) + [(0, Hp - H)]
    return jnp.pad(w4, pad).reshape(lead + (4 * Hp,))


def pack_params(params, input_size, hidden_size, output_size, *, hp=_HP):
    I, H, O = input_size, hidden_size, output_size
    assert H <= hp and O <= hp, "packing assumes H, O <= 128"
    Ip = ((I + 7) // 8) * 8

    w_ih = _pad_gate_cols(params["w_ih"], H, hp)                    # (I, 4Hp)
    w_ih = jnp.pad(w_ih, ((0, Ip - I), (0, 0)))                     # (Ip, 4Hp)
    w_hh = _pad_gate_cols(params["w_hh"], H, hp)                    # (H, 4Hp)
    w_hh = jnp.pad(w_hh, ((0, hp - H), (0, 0)))                     # (Hp, 4Hp)
    w_lstm = jnp.concatenate([w_ih, w_hh], axis=0)                  # (Ip+Hp, 4Hp)

    wc_ctx = jnp.pad(params["wc_ctx"], ((0, hp - H), (0, hp - H)))
    wc_hid = jnp.pad(params["wc_hid"], ((0, hp - H), (0, hp - H)))
    w_out = jnp.pad(params["w_out"], ((0, hp - H), (0, hp - O)))
    w_heads = jnp.concatenate([wc_ctx, wc_hid, w_out], axis=0)      # (3Hp, Hp)

    b_lstm = _pad_gate_cols(params["b_lstm"], H, hp)                # (1, 4Hp)
    b_concat = jnp.pad(params["b_concat"], ((0, 0), (0, hp - H)))   # (1, Hp)
    b_out = jnp.pad(params["b_out"], ((0, 0), (0, hp - O)))         # (1, Hp)
    b_all = jnp.concatenate([b_lstm, b_concat, b_out], axis=1)      # (1, 6Hp)

    return {"w_lstm": w_lstm, "w_heads": w_heads, "b_all": b_all}


# ---------------------------------------------------------------------------
# Wrapper (single pallas_call, single-block VMEM mapping: everything fits
# comfortably in VMEM at these sizes, no grid needed).
# ---------------------------------------------------------------------------
_VMEM = functools.partial(pl.BlockSpec, memory_space=pltpu.MemorySpace.VMEM)


def attn_decoder_forward(packed, x, hidden, encoder_outputs, *,
                         hidden_size, output_size):
    """Mirrors AttnDecoder.forward.

    x:               (B, T, input_size)  float (batch_first LSTM input)
    hidden:          (h0, c0), each (1, B, hidden_size)
    encoder_outputs: (S, 1, hidden_size)
    returns (output (B, output_size), hidden_state (B, H), cell_state (B, H))
    """
    h0, c0 = hidden
    B, T, I = x.shape
    H, O = hidden_size, output_size
    Hp = _HP
    Bp = max(8, ((B + 7) // 8) * 8)
    Ip = ((I + 7) // 8) * 8

    # Activations: time-major, batch padded to a full sublane tile, features
    # padded to Ip / Hp (zero padding is value-preserving; see kernel notes).
    x_tm = jnp.transpose(x, (1, 0, 2))                              # (T, B, I)
    x_tm = jnp.pad(x_tm, ((0, 0), (0, Bp - B), (0, Ip - I)))
    x_tm = x_tm.reshape(T * Bp, Ip)

    h0p = jnp.pad(h0[0], ((0, Bp - B), (0, Hp - H)))
    c0p = jnp.pad(c0[0], ((0, Bp - B), (0, Hp - H)))
    hc0 = jnp.concatenate([h0p, c0p], axis=1)                       # (Bp, 2Hp)

    enc = jnp.squeeze(encoder_outputs, axis=1)                      # (S, H)
    encp = jnp.pad(enc, ((0, 0), (0, Hp - H)))                      # (S, Hp)

    kernel = functools.partial(attn_decoder_kernel,
                               T=T, Bp=Bp, Ip=Ip, Hp=Hp, O=O)
    out_pack = pl.pallas_call(
        kernel,
        out_shape=jax.ShapeDtypeStruct((Bp, 3 * Hp), jnp.float32),
        in_specs=[_VMEM()] * 6,
        out_specs=_VMEM(),
    )(x_tm, hc0, packed["w_lstm"], packed["w_heads"], packed["b_all"], encp)

    out = out_pack[:B, :O]
    h_fin = out_pack[:B, Hp:Hp + H]
    c_fin = out_pack[:B, 2 * Hp:2 * Hp + H]
    return out, h_fin, c_fin


# ---------------------------------------------------------------------------
# Pure-JAX reference (natural shapes, same (i, f, o, g) gate-column layout).
# ---------------------------------------------------------------------------
def reference_forward(params, x, hidden, encoder_outputs):
    h0, c0 = hidden
    h, c = h0[0], c0[0]
    H = h.shape[1]
    T = x.shape[1]
    for t in range(T):
        gates = x[:, t, :] @ params["w_ih"] + h @ params["w_hh"] + params["b_lstm"]
        i_g = jax.nn.sigmoid(gates[:, 0 * H:1 * H])
        f_g = jax.nn.sigmoid(gates[:, 1 * H:2 * H])
        o_g = jax.nn.sigmoid(gates[:, 2 * H:3 * H])
        g_g = jnp.tanh(gates[:, 3 * H:4 * H])
        c = f_g * c + i_g * g_g
        h = o_g * jnp.tanh(c)
    enc = jnp.squeeze(encoder_outputs, axis=1)
    attn_w = jax.nn.softmax(h @ enc.T, axis=1)
    context = attn_w @ enc
    concat_out = jnp.tanh(context @ params["wc_ctx"] + h @ params["wc_hid"]
                          + params["b_concat"])
    out = jax.nn.softmax(concat_out @ params["w_out"] + params["b_out"], axis=1)
    return out, h, c


# ---------------------------------------------------------------------------
def init_params(key, input_size, hidden_size, output_size):
    ks = jax.random.split(key, 8)
    s = 0.1
    H = hidden_size
    return {
        # LSTM, stored transposed (in, 4H), gate column order (i, f, o, g),
        # b_ih + b_hh pre-folded into one bias.
        "w_ih": s * jax.random.normal(ks[0], (input_size, 4 * H), jnp.float32),
        "w_hh": s * jax.random.normal(ks[1], (H, 4 * H), jnp.float32),
        "b_lstm": s * jax.random.normal(ks[2], (1, 4 * H), jnp.float32),
        # concat Linear(2H -> H), split into the context / hidden halves.
        "wc_ctx": s * jax.random.normal(ks[3], (H, H), jnp.float32),
        "wc_hid": s * jax.random.normal(ks[4], (H, H), jnp.float32),
        "b_concat": s * jax.random.normal(ks[5], (1, H), jnp.float32),
        # output Linear(H -> output_size)
        "w_out": s * jax.random.normal(ks[6], (H, output_size), jnp.float32),
        "b_out": s * jax.random.normal(ks[7], (1, output_size), jnp.float32),
    }


if __name__ == "__main__":
    B, T, I, H, S, O = 2, 8, 16, 32, 8, 10

    key = jax.random.PRNGKey(0)
    k_p, k_x, k_h, k_c, k_e = jax.random.split(key, 5)

    params = init_params(k_p, I, H, O)
    packed = pack_params(params, I, H, O)        # one-time packing / padding

    x = jax.random.normal(k_x, (B, T, I), jnp.float32)             # LSTM input
    h0 = jax.random.normal(k_h, (1, B, H), jnp.float32)
    c0 = jax.random.normal(k_c, (1, B, H), jnp.float32)
    encoder_outputs = jax.random.normal(k_e, (S, 1, H), jnp.float32)

    fwd = jax.jit(functools.partial(attn_decoder_forward,
                                    hidden_size=H, output_size=O))
    out, hid, cell = fwd(packed, x, (h0, c0), encoder_outputs)
    jax.block_until_ready((out, hid, cell))

    ref_out, ref_hid, ref_cell = reference_forward(
        params, x, (h0, c0), encoder_outputs)

    assert out.shape == (B, O) and hid.shape == (B, H) and cell.shape == (B, H)
    # hidden/cell never touch the approx reciprocal -> tight tolerance.
    assert jnp.allclose(hid, ref_hid, atol=1e-5, rtol=1e-5)
    assert jnp.allclose(cell, ref_cell, atol=1e-5, rtol=1e-5)
    # attention softmax uses pl.reciprocal(approx=True) upstream -> 1e-3.
    assert jnp.allclose(out, ref_out, atol=1e-3, rtol=1e-3)
    # output softmax itself uses an exact divide -> rows sum to 1 tightly.
    assert jnp.allclose(jnp.sum(out, axis=1), jnp.ones((B,)), atol=1e-4)

    print("KERNEL_OK")
</pallas_src>

<mosaic_0001>
module attributes {stable_mosaic.version = 11 : i64} {
  func.func @attn_decoder_kernel(%arg0: memref<64x16xf32, #tpu.memory_space<vmem>>, %arg1: memref<8x256xf32, #tpu.memory_space<vmem>>, %arg2: memref<144x512xf32, #tpu.memory_space<vmem>>, %arg3: memref<384x128xf32, #tpu.memory_space<vmem>>, %arg4: memref<1x768xf32, #tpu.memory_space<vmem>>, %arg5: memref<8x128xf32, #tpu.memory_space<vmem>>, %arg6: memref<8x384xf32, #tpu.memory_space<vmem>>) attributes {dimension_semantics = [], scalar_prefetch = 0 : i64, scratch_operands = 0 : i64, tpu.core_type = #tpu.core_type<tc>} {
    %c0 = arith.constant 0 : index
    %c0_0 = arith.constant 0 : index
    %0 = vector.load %arg2[%c0, %c0_0] : memref<144x512xf32, #tpu.memory_space<vmem>>, vector<16x512xf32>
    %c16 = arith.constant 16 : index
    %c0_1 = arith.constant 0 : index
    %1 = vector.load %arg2[%c16, %c0_1] : memref<144x512xf32, #tpu.memory_space<vmem>>, vector<128x512xf32>
    %c0_2 = arith.constant 0 : index
    %c0_3 = arith.constant 0 : index
    %2 = vector.load %arg4[%c0_2, %c0_3] : memref<1x768xf32, #tpu.memory_space<vmem>>, vector<1x512xf32>
    %c0_4 = arith.constant 0 : index
    %c512 = arith.constant 512 : index
    %3 = vector.load %arg4[%c0_4, %c512] : memref<1x768xf32, #tpu.memory_space<vmem>>, vector<1x128xf32>
    %c0_5 = arith.constant 0 : index
    %c640 = arith.constant 640 : index
    %4 = vector.load %arg4[%c0_5, %c640] : memref<1x768xf32, #tpu.memory_space<vmem>>, vector<1x128xf32>
    %c0_6 = arith.constant 0 : index
    %c0_7 = arith.constant 0 : index
    %5 = vector.load %arg0[%c0_6, %c0_7] : memref<64x16xf32, #tpu.memory_space<vmem>>, vector<64x16xf32>
    %cst = arith.constant dense<0.000000e+00> : vector<64x512xf32>
    %6 = tpu.matmul %5, %0, %cst {dimension_numbers = #tpu.dot_dimension_numbers<[1], [0], [0], [1], [0, 0, 1, 1], [], []>} : vector<64x16xf32>, vector<16x512xf32>, vector<64x512xf32> -> vector<64x512xf32>
    %7 = vector.broadcast %2 : vector<1x512xf32> to vector<64x512xf32>
    %8 = arith.addf %6, %7 : vector<64x512xf32>
    %c0_8 = arith.constant 0 : index
    %c0_9 = arith.constant 0 : index
    %9 = vector.load %arg1[%c0_8, %c0_9] : memref<8x256xf32, #tpu.memory_space<vmem>>, vector<8x128xf32>
    %c0_10 = arith.constant 0 : index
    %c128 = arith.constant 128 : index
    %10 = vector.load %arg1[%c0_10, %c128] : memref<8x256xf32, #tpu.memory_space<vmem>>, vector<8x128xf32>
    %11 = vector.extract_strided_slice %8 {offsets = [0, 0], sizes = [8, 512], strides = [1, 1]} : vector<64x512xf32> to vector<8x512xf32>
    %cst_11 = arith.constant dense<0.000000e+00> : vector<8x512xf32>
    %12 = tpu.matmul %9, %1, %cst_11 {dimension_numbers = #tpu.dot_dimension_numbers<[1], [0], [0], [1], [0, 0, 1, 1], [], []>} : vector<8x128xf32>, vector<128x512xf32>, vector<8x512xf32> -> vector<8x512xf32>
    %13 = arith.addf %11, %12 : vector<8x512xf32>
    %14 = vector.extract_strided_slice %13 {offsets = [0, 0], sizes = [8, 384], strides = [1, 1]} : vector<8x512xf32> to vector<8x384xf32>
    %15 = arith.negf %14 : vector<8x384xf32>
    %16 = math.exp %15 : vector<8x384xf32>
    %cst_12 = arith.constant 1.000000e+00 : f32
    %17 = vector.broadcast %cst_12 : f32 to vector<8x384xf32>
    %18 = arith.addf %17, %16 : vector<8x384xf32>
    %19 = arith.divf %17, %18 : vector<8x384xf32>
    %20 = vector.extract_strided_slice %19 {offsets = [0, 0], sizes = [8, 128], strides = [1, 1]} : vector<8x384xf32> to vector<8x128xf32>
    %21 = vector.extract_strided_slice %19 {offsets = [0, 128], sizes = [8, 128], strides = [1, 1]} : vector<8x384xf32> to vector<8x128xf32>
    %22 = vector.extract_strided_slice %19 {offsets = [0, 256], sizes = [8, 128], strides = [1, 1]} : vector<8x384xf32> to vector<8x128xf32>
    %23 = vector.extract_strided_slice %13 {offsets = [0, 384], sizes = [8, 128], strides = [1, 1]} : vector<8x512xf32> to vector<8x128xf32>
    %24 = math.tanh %23 : vector<8x128xf32>
    %25 = arith.mulf %21, %10 : vector<8x128xf32>
    %26 = arith.mulf %20, %24 : vector<8x128xf32>
    %27 = arith.addf %25, %26 : vector<8x128xf32>
    %28 = math.tanh %27 : vector<8x128xf32>
    %29 = arith.mulf %22, %28 : vector<8x128xf32>
    %30 = vector.extract_strided_slice %8 {offsets = [8, 0], sizes = [8, 512], strides = [1, 1]} : vector<64x512xf32> to vector<8x512xf32>
    %cst_13 = arith.constant dense<0.000000e+00> : vector<8x512xf32>
    %31 = tpu.matmul %29, %1, %cst_13 {dimension_numbers = #tpu.dot_dimension_numbers<[1], [0], [0], [1], [0, 0, 1, 1], [], []>} : vector<8x128xf32>, vector<128x512xf32>, vector<8x512xf32> -> vector<8x512xf32>
    %32 = arith.addf %30, %31 : vector<8x512xf32>
    %33 = vector.extract_strided_slice %32 {offsets = [0, 0], sizes = [8, 384], strides = [1, 1]} : vector<8x512xf32> to vector<8x384xf32>
    %34 = arith.negf %33 : vector<8x384xf32>
    %35 = math.exp %34 : vector<8x384xf32>
    %cst_14 = arith.constant 1.000000e+00 : f32
    %36 = vector.broadcast %cst_14 : f32 to vector<8x384xf32>
    %37 = arith.addf %36, %35 : vector<8x384xf32>
    %38 = arith.divf %36, %37 : vector<8x384xf32>
    %39 = vector.extract_strided_slice %38 {offsets = [0, 0], sizes = [8, 128], strides = [1, 1]} : vector<8x384xf32> to vector<8x128xf32>
    %40 = vector.extract_strided_slice %38 {offsets = [0, 128], sizes = [8, 128], strides = [1, 1]} : vector<8x384xf32> to vector<8x128xf32>
    %41 = vector.extract_strided_slice %38 {offsets = [0, 256], sizes = [8, 128], strides = [1, 1]} : vector<8x384xf32> to vector<8x128xf32>
    %42 = vector.extract_strided_slice %32 {offsets = [0, 384], sizes = [8, 128], strides = [1, 1]} : vector<8x512xf32> to vector<8x128xf32>
    %43 = math.tanh %42 : vector<8x128xf32>
    %44 = arith.mulf %40, %27 : vector<8x128xf32>
    %45 = arith.mulf %39, %43 : vector<8x128xf32>
    %46 = arith.addf %44, %45 : vector<8x128xf32>
    %47 = math.tanh %46 : vector<8x128xf32>
    %48 = arith.mulf %41, %47 : vector<8x128xf32>
    %49 = vector.extract_strided_slice %8 {offsets = [16, 0], sizes = [8, 512], strides = [1, 1]} : vector<64x512xf32> to vector<8x512xf32>
    %cst_15 = arith.constant dense<0.000000e+00> : vector<8x512xf32>
    %50 = tpu.matmul %48, %1, %cst_15 {dimension_numbers = #tpu.dot_dimension_numbers<[1], [0], [0], [1], [0, 0, 1, 1], [], []>} : vector<8x128xf32>, vector<128x512xf32>, vector<8x512xf32> -> vector<8x512xf32>
    %51 = arith.addf %49, %50 : vector<8x512xf32>
    %52 = vector.extract_strided_slice %51 {offsets = [0, 0], sizes = [8, 384], strides = [1, 1]} : vector<8x512xf32> to vector<8x384xf32>
    %53 = arith.negf %52 : vector<8x384xf32>
    %54 = math.exp %53 : vector<8x384xf32>
    %cst_16 = arith.constant 1.000000e+00 : f32
    %55 = vector.broadcast %cst_16 : f32 to vector<8x384xf32>
    %56 = arith.addf %55, %54 : vector<8x384xf32>
    %57 = arith.divf %55, %56 : vector<8x384xf32>
    %58 = vector.extract_strided_slice %57 {offsets = [0, 0], sizes = [8, 128], strides = [1, 1]} : vector<8x384xf32> to vector<8x128xf32>
    %59 = vector.extract_strided_slice %57 {offsets = [0, 128], sizes = [8, 128], strides = [1, 1]} : vector<8x384xf32> to vector<8x128xf32>
    %60 = vector.extract_strided_slice %57 {offsets = [0, 256], sizes = [8, 128], strides = [1, 1]} : vector<8x384xf32> to vector<8x128xf32>
    %61 = vector.extract_strided_slice %51 {offsets = [0, 384], sizes = [8, 128], strides = [1, 1]} : vector<8x512xf32> to vector<8x128xf32>
    %62 = math.tanh %61 : vector<8x128xf32>
    %63 = arith.mulf %59, %46 : vector<8x128xf32>
    %64 = arith.mulf %58, %62 : vector<8x128xf32>
    %65 = arith.addf %63, %64 : vector<8x128xf32>
    %66 = math.tanh %65 : vector<8x128xf32>
    %67 = arith.mulf %60, %66 : vector<8x128xf32>
    %68 = vector.extract_strided_slice %8 {offsets = [24, 0], sizes = [8, 512], strides = [1, 1]} : vector<64x512xf32> to vector<8x512xf32>
    %cst_17 = arith.constant dense<0.000000e+00> : vector<8x512xf32>
    %69 = tpu.matmul %67, %1, %cst_17 {dimension_numbers = #tpu.dot_dimension_numbers<[1], [0], [0], [1], [0, 0, 1, 1], [], []>} : vector<8x128xf32>, vector<128x512xf32>, vector<8x512xf32> -> vector<8x512xf32>
    %70 = arith.addf %68, %69 : vector<8x512xf32>
    %71 = vector.extract_strided_slice %70 {offsets = [0, 0], sizes = [8, 384], strides = [1, 1]} : vector<8x512xf32> to vector<8x384xf32>
    %72 = arith.negf %71 : vector<8x384xf32>
    %73 = math.exp %72 : vector<8x384xf32>
    %cst_18 = arith.constant 1.000000e+00 : f32
    %74 = vector.broadcast %cst_18 : f32 to vector<8x384xf32>
    %75 = arith.addf %74, %73 : vector<8x384xf32>
    %76 = arith.divf %74, %75 : vector<8x384xf32>
    %77 = vector.extract_strided_slice %76 {offsets = [0, 0], sizes = [8, 128], strides = [1, 1]} : vector<8x384xf32> to vector<8x128xf32>
    %78 = vector.extract_strided_slice %76 {offsets = [0, 128], sizes = [8, 128], strides = [1, 1]} : vector<8x384xf32> to vector<8x128xf32>
    %79 = vector.extract_strided_slice %76 {offsets = [0, 256], sizes = [8, 128], strides = [1, 1]} : vector<8x384xf32> to vector<8x128xf32>
    %80 = vector.extract_strided_slice %70 {offsets = [0, 384], sizes = [8, 128], strides = [1, 1]} : vector<8x512xf32> to vector<8x128xf32>
    %81 = math.tanh %80 : vector<8x128xf32>
    %82 = arith.mulf %78, %65 : vector<8x128xf32>
    %83 = arith.mulf %77, %81 : vector<8x128xf32>
    %84 = arith.addf %82, %83 : vector<8x128xf32>
    %85 = math.tanh %84 : vector<8x128xf32>
    %86 = arith.mulf %79, %85 : vector<8x128xf32>
    %87 = vector.extract_strided_slice %8 {offsets = [32, 0], sizes = [8, 512], strides = [1, 1]} : vector<64x512xf32> to vector<8x512xf32>
    %cst_19 = arith.constant dense<0.000000e+00> : vector<8x512xf32>
    %88 = tpu.matmul %86, %1, %cst_19 {dimension_numbers = #tpu.dot_dimension_numbers<[1], [0], [0], [1], [0, 0, 1, 1], [], []>} : vector<8x128xf32>, vector<128x512xf32>, vector<8x512xf32> -> vector<8x512xf32>
    %89 = arith.addf %87, %88 : vector<8x512xf32>
    %90 = vector.extract_strided_slice %89 {offsets = [0, 0], sizes = [8, 384], strides = [1, 1]} : vector<8x512xf32> to vector<8x384xf32>
    %91 = arith.negf %90 : vector<8x384xf32>
    %92 = math.exp %91 : vector<8x384xf32>
    %cst_20 = arith.constant 1.000000e+00 : f32
    %93 = vector.broadcast %cst_20 : f32 to vector<8x384xf32>
    %94 = arith.addf %93, %92 : vector<8x384xf32>
    %95 = arith.divf %93, %94 : vector<8x384xf32>
    %96 = vector.extract_strided_slice %95 {offsets = [0, 0], sizes = [8, 128], strides = [1, 1]} : vector<8x384xf32> to vector<8x128xf32>
    %97 = vector.extract_strided_slice %95 {offsets = [0, 128], sizes = [8, 128], strides = [1, 1]} : vector<8x384xf32> to vector<8x128xf32>
    %98 = vector.extract_strided_slice %95 {offsets = [0, 256], sizes = [8, 128], strides = [1, 1]} : vector<8x384xf32> to vector<8x128xf32>
    %99 = vector.extract_strided_slice %89 {offsets = [0, 384], sizes = [8, 128], strides = [1, 1]} : vector<8x512xf32> to vector<8x128xf32>
    %100 = math.tanh %99 : vector<8x128xf32>
    %101 = arith.mulf %97, %84 : vector<8x128xf32>
    %102 = arith.mulf %96, %100 : vector<8x128xf32>
    %103 = arith.addf %101, %102 : vector<8x128xf32>
    %104 = math.tanh %103 : vector<8x128xf32>
    %105 = arith.mulf %98, %104 : vector<8x128xf32>
    %106 = vector.extract_strided_slice %8 {offsets = [40, 0], sizes = [8, 512], strides = [1, 1]} : vector<64x512xf32> to vector<8x512xf32>
    %cst_21 = arith.constant dense<0.000000e+00> : vector<8x512xf32>
    %107 = tpu.matmul %105, %1, %cst_21 {dimension_numbers = #tpu.dot_dimension_numbers<[1], [0], [0], [1], [0, 0, 1, 1], [], []>} : vector<8x128xf32>, vector<128x512xf32>, vector<8x512xf32> -> vector<8x512xf32>
    %108 = arith.addf %106, %107 : vector<8x512xf32>
    %109 = vector.extract_strided_slice %108 {offsets = [0, 0], sizes = [8, 384], strides = [1, 1]} : vector<8x512xf32> to vector<8x384xf32>
    %110 = arith.negf %109 : vector<8x384xf32>
    %111 = math.exp %110 : vector<8x384xf32>
    %cst_22 = arith.constant 1.000000e+00 : f32
    %112 = vector.broadcast %cst_22 : f32 to vector<8x384xf32>
    %113 = arith.addf %112, %111 : vector<8x384xf32>
    %114 = arith.divf %112, %113 : vector<8x384xf32>
    %115 = vector.extract_strided_slice %114 {offsets = [0, 0], sizes = [8, 128], strides = [1, 1]} : vector<8x384xf32> to vector<8x128xf32>
    %116 = vector.extract_strided_slice %114 {offsets = [0, 128], sizes = [8, 128], strides = [1, 1]} : vector<8x384xf32> to vector<8x128xf32>
    %117 = vector.extract_strided_slice %114 {offsets = [0, 256], sizes = [8, 128], strides = [1, 1]} : vector<8x384xf32> to vector<8x128xf32>
    %118 = vector.extract_strided_slice %108 {offsets = [0, 384], sizes = [8, 128], strides = [1, 1]} : vector<8x512xf32> to vector<8x128xf32>
    %119 = math.tanh %118 : vector<8x128xf32>
    %120 = arith.mulf %116, %103 : vector<8x128xf32>
    %121 = arith.mulf %115, %119 : vector<8x128xf32>
    %122 = arith.addf %120, %121 : vector<8x128xf32>
    %123 = math.tanh %122 : vector<8x128xf32>
    %124 = arith.mulf %117, %123 : vector<8x128xf32>
    %125 = vector.extract_strided_slice %8 {offsets = [48, 0], sizes = [8, 512], strides = [1, 1]} : vector<64x512xf32> to vector<8x512xf32>
    %cst_23 = arith.constant dense<0.000000e+00> : vector<8x512xf32>
    %126 = tpu.matmul %124, %1, %cst_23 {dimension_numbers = #tpu.dot_dimension_numbers<[1], [0], [0], [1], [0, 0, 1, 1], [], []>} : vector<8x128xf32>, vector<128x512xf32>, vector<8x512xf32> -> vector<8x512xf32>
    %127 = arith.addf %125, %126 : vector<8x512xf32>
    %128 = vector.extract_strided_slice %127 {offsets = [0, 0], sizes = [8, 384], strides = [1, 1]} : vector<8x512xf32> to vector<8x384xf32>
    %129 = arith.negf %128 : vector<8x384xf32>
    %130 = math.exp %129 : vector<8x384xf32>
    %cst_24 = arith.constant 1.000000e+00 : f32
    %131 = vector.broadcast %cst_24 : f32 to vector<8x384xf32>
    %132 = arith.addf %131, %130 : vector<8x384xf32>
    %133 = arith.divf %131, %132 : vector<8x384xf32>
    %134 = vector.extract_strided_slice %133 {offsets = [0, 0], sizes = [8, 128], strides = [1, 1]} : vector<8x384xf32> to vector<8x128xf32>
    %135 = vector.extract_strided_slice %133 {offsets = [0, 128], sizes = [8, 128], strides = [1, 1]} : vector<8x384xf32> to vector<8x128xf32>
    %136 = vector.extract_strided_slice %133 {offsets = [0, 256], sizes = [8, 128], strides = [1, 1]} : vector<8x384xf32> to vector<8x128xf32>
    %137 = vector.extract_strided_slice %127 {offsets = [0, 384], sizes = [8, 128], strides = [1, 1]} : vector<8x512xf32> to vector<8x128xf32>
    %138 = math.tanh %137 : vector<8x128xf32>
    %139 = arith.mulf %135, %122 : vector<8x128xf32>
    %140 = arith.mulf %134, %138 : vector<8x128xf32>
    %141 = arith.addf %139, %140 : vector<8x128xf32>
    %142 = math.tanh %141 : vector<8x128xf32>
    %143 = arith.mulf %136, %142 : vector<8x128xf32>
    %144 = vector.extract_strided_slice %8 {offsets = [56, 0], sizes = [8, 512], strides = [1, 1]} : vector<64x512xf32> to vector<8x512xf32>
    %cst_25 = arith.constant dense<0.000000e+00> : vector<8x512xf32>
    %145 = tpu.matmul %143, %1, %cst_25 {dimension_numbers = #tpu.dot_dimension_numbers<[1], [0], [0], [1], [0, 0, 1, 1], [], []>} : vector<8x128xf32>, vector<128x512xf32>, vector<8x512xf32> -> vector<8x512xf32>
    %146 = arith.addf %144, %145 : vector<8x512xf32>
    %147 = vector.extract_strided_slice %146 {offsets = [0, 0], sizes = [8, 384], strides = [1, 1]} : vector<8x512xf32> to vector<8x384xf32>
    %148 = arith.negf %147 : vector<8x384xf32>
    %149 = math.exp %148 : vector<8x384xf32>
    %cst_26 = arith.constant 1.000000e+00 : f32
    %150 = vector.broadcast %cst_26 : f32 to vector<8x384xf32>
    %151 = arith.addf %150, %149 : vector<8x384xf32>
    %152 = arith.divf %150, %151 : vector<8x384xf32>
    %153 = vector.extract_strided_slice %152 {offsets = [0, 0], sizes = [8, 128], strides = [1, 1]} : vector<8x384xf32> to vector<8x128xf32>
    %154 = vector.extract_strided_slice %152 {offsets = [0, 128], sizes = [8, 128], strides = [1, 1]} : vector<8x384xf32> to vector<8x128xf32>
    %155 = vector.extract_strided_slice %152 {offsets = [0, 256], sizes = [8, 128], strides = [1, 1]} : vector<8x384xf32> to vector<8x128xf32>
    %156 = vector.extract_strided_slice %146 {offsets = [0, 384], sizes = [8, 128], strides = [1, 1]} : vector<8x512xf32> to vector<8x128xf32>
    %157 = math.tanh %156 : vector<8x128xf32>
    %158 = arith.mulf %154, %141 : vector<8x128xf32>
    %159 = arith.mulf %153, %157 : vector<8x128xf32>
    %160 = arith.addf %158, %159 : vector<8x128xf32>
    %161 = math.tanh %160 : vector<8x128xf32>
    %162 = arith.mulf %155, %161 : vector<8x128xf32>
    %c0_27 = arith.constant 0 : index
    %c0_28 = arith.constant 0 : index
    %163 = vector.load %arg5[%c0_27, %c0_28] : memref<8x128xf32, #tpu.memory_space<vmem>>, vector<8x128xf32>
    %cst_29 = arith.constant dense<0.000000e+00> : vector<8x8xf32>
    %164 = tpu.matmul %162, %163, %cst_29 {dimension_numbers = #tpu.dot_dimension_numbers<[1], [1], [0], [0], [0, 0, 1, 0], [], []>} : vector<8x128xf32>, vector<8x128xf32>, vector<8x8xf32> -> vector<8x8xf32>
    %cst_30 = arith.constant dense<0xFF800000> : vector<8xf32>
    %165 = vector.multi_reduction <maximumf>, %164, %cst_30 [1] : vector<8x8xf32> to vector<8xf32>
    %166 = vector.shape_cast %165 : vector<8xf32> to vector<8x1xf32>
    %167 = vector.broadcast %166 : vector<8x1xf32> to vector<8x8xf32>
    %168 = arith.subf %164, %167 : vector<8x8xf32>
    %169 = math.exp %168 : vector<8x8xf32>
    %cst_31 = arith.constant dense<0.000000e+00> : vector<8xf32>
    %170 = vector.multi_reduction <add>, %169, %cst_31 [1] : vector<8x8xf32> to vector<8xf32>
    %171 = vector.shape_cast %170 : vector<8xf32> to vector<8x1xf32>
    %172 = tpu.reciprocal %171 {approx = true} : vector<8x1xf32> -> vector<8x1xf32>
    %173 = vector.broadcast %172 : vector<8x1xf32> to vector<8x8xf32>
    %174 = arith.mulf %169, %173 : vector<8x8xf32>
    %cst_32 = arith.constant dense<0.000000e+00> : vector<8x128xf32>
    %175 = tpu.matmul %174, %163, %cst_32 {dimension_numbers = #tpu.dot_dimension_numbers<[1], [0], [0], [1], [0, 0, 1, 1], [], []>} : vector<8x8xf32>, vector<8x128xf32>, vector<8x128xf32> -> vector<8x128xf32>
    %176 = tpu.concatenate %175, %162 in 1 : vector<8x128xf32>, vector<8x128xf32> -> vector<8x256xf32>
    %c0_33 = arith.constant 0 : index
    %c0_34 = arith.constant 0 : index
    %177 = vector.load %arg3[%c0_33, %c0_34] : memref<384x128xf32, #tpu.memory_space<vmem>>, vector<256x128xf32>
    %cst_35 = arith.constant dense<0.000000e+00> : vector<8x128xf32>
    %178 = tpu.matmul %176, %177, %cst_35 {dimension_numbers = #tpu.dot_dimension_numbers<[1], [0], [0], [1], [0, 0, 1, 1], [], []>} : vector<8x256xf32>, vector<256x128xf32>, vector<8x128xf32> -> vector<8x128xf32>
    %179 = vector.broadcast %3 : vector<1x128xf32> to vector<8x128xf32>
    %180 = arith.addf %178, %179 : vector<8x128xf32>
    %181 = math.tanh %180 : vector<8x128xf32>
    %c256 = arith.constant 256 : index
    %c0_36 = arith.constant 0 : index
    %182 = vector.load %arg3[%c256, %c0_36] : memref<384x128xf32, #tpu.memory_space<vmem>>, vector<128x128xf32>
    %cst_37 = arith.constant dense<0.000000e+00> : vector<8x128xf32>
    %183 = tpu.matmul %181, %182, %cst_37 {dimension_numbers = #tpu.dot_dimension_numbers<[1], [0], [0], [1], [0, 0, 1, 1], [], []>} : vector<8x128xf32>, vector<128x128xf32>, vector<8x128xf32> -> vector<8x128xf32>
    %184 = vector.broadcast %4 : vector<1x128xf32> to vector<8x128xf32>
    %185 = arith.addf %183, %184 : vector<8x128xf32>
    %186 = tpu.iota {dimensions = array<i32: 1>} : vector<8x128xi32>
    %c10_i32 = arith.constant 10 : i32
    %187 = vector.broadcast %c10_i32 : i32 to vector<8x128xi32>
    %188 = arith.cmpi slt, %186, %187 : vector<8x128xi32>
    %cst_38 = arith.constant -1.000000e+30 : f32
    %189 = vector.broadcast %cst_38 : f32 to vector<8x128xf32>
    %190 = arith.select %188, %185, %189 : vector<8x128xi1>, vector<8x128xf32>
    %cst_39 = arith.constant dense<0xFF800000> : vector<8xf32>
    %191 = vector.multi_reduction <maximumf>, %190, %cst_39 [1] : vector<8x128xf32> to vector<8xf32>
    %192 = vector.shape_cast %191 : vector<8xf32> to vector<8x1xf32>
    %193 = vector.broadcast %192 : vector<8x1xf32> to vector<8x128xf32>
    %194 = arith.subf %190, %193 : vector<8x128xf32>
    %195 = math.exp %194 : vector<8x128xf32>
    %cst_40 = arith.constant dense<0.000000e+00> : vector<8xf32>
    %196 = vector.multi_reduction <add>, %195, %cst_40 [1] : vector<8x128xf32> to vector<8xf32>
    %197 = vector.shape_cast %196 : vector<8xf32> to vector<8x1xf32>
    %198 = vector.broadcast %197 : vector<8x1xf32> to vector<8x128xf32>
    %199 = arith.divf %195, %198 : vector<8x128xf32>
    %c0_41 = arith.constant 0 : index
    %c0_42 = arith.constant 0 : index
    %200 = vector.load %arg6[%c0_41, %c0_42] : memref<8x384xf32, #tpu.memory_space<vmem>>, vector<8x128xf32>
    tpu.vector_store %arg6[%c0_41, %c0_42], %199 {strides = array<i32>} : memref<8x384xf32, #tpu.memory_space<vmem>>, vector<8x128xf32>,
    %c0_43 = arith.constant 0 : index
    %c128_44 = arith.constant 128 : index
    %201 = vector.load %arg6[%c0_43, %c128_44] : memref<8x384xf32, #tpu.memory_space<vmem>>, vector<8x128xf32>
    tpu.vector_store %arg6[%c0_43, %c128_44], %162 {strides = array<i32>} : memref<8x384xf32, #tpu.memory_space<vmem>>, vector<8x128xf32>,
    %c0_45 = arith.constant 0 : index
    %c256_46 = arith.constant 256 : index
    %202 = vector.load %arg6[%c0_45, %c256_46] : memref<8x384xf32, #tpu.memory_space<vmem>>, vector<8x128xf32>
    tpu.vector_store %arg6[%c0_45, %c256_46], %160 {strides = array<i32>} : memref<8x384xf32, #tpu.memory_space<vmem>>, vector<8x128xf32>,
    return
  }
}

</mosaic_0001>

<bundles_post_ra>
// kernel: attn_decoder_forward.1
= control target key start
LH: loop header
LB: loop body
LE: loop exit
PB: predicated region body
PF: predicated region fallthrough
CT: control target
= control target key end

     0   :  { %11 = vsyncpa [#allocation3], 0  ;;  %s3694_s0 = inlined_call_operand.vmem [shape: f32[64,16], index: 0, kind: input, shape index: {}]   ;;  %s3695_s1 = inlined_call_operand.vmem [shape: f32[8,256], index: 1, kind: input, shape index: {}]   ;;  %s3696_s2 = inlined_call_operand.hbm [shape: f32[144,512], index: 2, kind: input, shape index: {}]   ;;  %s3697_s3 = inlined_call_operand.hbm [shape: f32[384,128], index: 3, kind: input, shape index: {}]   ;;  %s3698_s4 = inlined_call_operand.vmem [shape: f32[1,768], index: 4, kind: input, shape index: {}]   ;;  %s3699_s5 = inlined_call_operand.vmem [shape: f32[8,128], index: 5, kind: input, shape index: {}]   ;;  %s3700_s6 = inlined_call_operand.vmem [shape: f32[8,384], index: 6, kind: output, shape index: {}]  }
   0x1   :  { %12 = vsyncpa [#allocation5], 0  ;;  %s3126_s21 = smov [#allocation2]   ;;  %s3078_s25 = scalar_lea.hbm %s3696_s2, 9216 }
   0x2   :  { %s22_s22 = sshll.u32 %s3126_s21, 4  ;;  %p3079_p0 = scmp.ne.s32.totalorder %s3696_s2, %s3078_s25  ;;  %s23_s22 = int_to_ptr.vmem [resolvable:$true] %s22_s22 }
   0x3   :  { %p3082_p1 = scmp.lt.u32.totalorder %s3078_s25, %s3696_s2 }
   0x5   :  { %p3084_p2 = pnand %p3082_p1, %p3079_p0 }
   0x7   :  { %3087 = shalt.err (!%p3084_p2)
}
   0x8   :  { %s3088_s30 = scalar_lea.vmem %s23_s22, 9216  ;;  %p3093_p4 = scmp.lt.s32.totalorder %s23_s22, %s23_s22 }
   0x9   :  { %p3089_p3 = scmp.ne.s32.totalorder %s23_s22, %s3088_s30  ;;  %p3094_p5 = scmp.lt.s32.totalorder %s3088_s30, %s3088_s30 }
   0xb   :  { %p3095_p6 = por %p3094_p5, %p3093_p4 }
   0xd   :  { %p3096_p7 = pnand %p3095_p6, %p3089_p3 }
   0xf   :  { %3099 = shalt.err (!%p3096_p7)
}
  0x10   :  { %s3127_s7 = smov 512   ;;  %s3128_s8 = smov 32  }
  0x11   :  { %28 = dma.hbm_to_vmem [thread:$0]  %s3696_s2, 9216, %s23_s22, [#allocation3], %s3127_s7, %s3127_s7, %s3128_s8  }
  0x12   :  { %s3129_s11 = smov [#allocation4]   ;;  %s3100_s15 = scalar_lea.hbm %s3697_s3, 6144 }
  0x13   :  { %s34_s12 = sshll.u32 %s3129_s11, 4  ;;  %p3101_p8 = scmp.ne.s32.totalorder %s3697_s3, %s3100_s15  ;;  %s35_s12 = int_to_ptr.vmem [resolvable:$true] %s34_s12 }
  0x14   :  { %p3104_p9 = scmp.lt.u32.totalorder %s3100_s15, %s3697_s3 }
  0x16   :  { %p3106_p10 = pnand %p3104_p9, %p3101_p8 }
  0x18   :  { %3109 = shalt.err (!%p3106_p10)
}
  0x19   :  { %s3110_s20 = scalar_lea.vmem %s35_s12, 6144  ;;  %p3115_p12 = scmp.lt.s32.totalorder %s35_s12, %s35_s12 }
  0x1a   :  { %p3111_p11 = scmp.ne.s32.totalorder %s35_s12, %s3110_s20  ;;  %p3116_p13 = scmp.lt.s32.totalorder %s3110_s20, %s3110_s20 }
  0x1c   :  { %p3117_p0 = por %p3116_p13, %p3115_p12 }
  0x1e   :  { %p3118_p1 = pnand %p3117_p0, %p3111_p11 }
  0x20   :  { %3121 = shalt.err (!%p3118_p1)
}
  0x21   :  { %s3130_s2 = smov 128   ;;  %s3131_s21 = smov 8  }
  0x22   :  { %40 = dma.hbm_to_vmem [thread:$0]  %s3697_s3, 6144, %s35_s12, [#allocation5], %s3130_s2, %s3130_s2, %s3131_s21  }
  0x23   :  { %3122 = dma.done.wait [#allocation3], 9216  }
  0x24   :  { %3123 = vsyncadd [#allocation3], 4294958080 }
  0x25   :  { %3124 = dma.done.wait [#allocation5], 6144  }
  0x26   :  { %3125 = vsyncadd [#allocation5], 4294961152  ;;  %v3132_v0 = vmov 0.0   ;;  %v52_v1 = vld [vmem:[#allocation2 + $0x8] sm:$0xff]  ;;  %v54_v3 = vld [vmem:[#allocation2 + $0x18] sm:$0xff]  ;;  %vm155_vm0 = vcmask 130048  }
  0x27   :  { %244 = vmatprep.mubr.f32.mxu0 %v3132_v0  ;;  %357 = vmatprep.mubr.f32.mxu1 %v3132_v0  ;;  %v56_v2 = vld [vmem:[#allocation2 + $0x28] sm:$0xff]  ;;  %v58_v5 = vld [vmem:[#allocation2 + $0x38] sm:$0xff]  ;;  %v51_v6 = vld [vmem:[#allocation2] sm:$0xff]  ;;  %vm3133_vm1 = vmmov 0   ;;  %vm1839_vm2 = vcmask 64512  }
  0x28   :  { %v2291_v4 = vpack.c.bf16 %v56_v2, %v52_v1  ;;  %v55_v7 = vld [vmem:[#allocation2 + $0x20] sm:$0xff]  ;;  %v2295_v8 = vpack.c.bf16 %v58_v5, %v54_v3  ;;  %v53_v10 = vld [vmem:[#allocation2 + $0x10] sm:$0xff]  ;;  %v60_v14 = vld [vmem:[#allocation2 + $0x48] sm:$0xff] }
  0x29   :  { %v2293_v9 = vpack.c.bf16 %v55_v7, %v51_v6  ;;  %v57_v11 = vld [vmem:[#allocation2 + $0x30] sm:$0xff]  ;;  %v126_v12 = vld [vmem:[%s3694_s0] sm:$0xff]  ;;  %v64_v15 = vld [vmem:[#allocation2 + $0x68] sm:$0xff] }
  0x2a   :  { %2292 = vmatprep.subr.bf16.mxu0 %v2291_v4  ;;  %v2297_v13 = vpack.c.bf16 %v57_v11, %v53_v10  ;;  %v62_v16 = vld [vmem:[#allocation2 + $0x58] sm:$0xff]  ;;  %2296 = vmatprep.subr.bf16.mxu1 %v2295_v8  ;;  %v3199_v17 = vpack.c.bf16 %v64_v15, %v60_v14  ;;  %v59_v19 = vld [vmem:[#allocation2 + $0x40] sm:$0xff]  ;;  %v61_v23 = vld [vmem:[#allocation2 + $0x50] sm:$0xff] }
  0x2b   :  { %2294 = vmatpush1.bf16.msra.mxu0 %v2293_v9  ;;  %v66_v18 = vld [vmem:[#allocation2 + $0x78] sm:$0xff]  ;;  %v63_v20 = vld [vmem:[#allocation2 + $0x60] sm:$0xff]  ;;  %v65_v24 = vld [vmem:[#allocation2 + $0x70] sm:$0xff] }
  0x2c   :  { %2298 = vmatpush1.bf16.msra.mxu1 %v2297_v13  ;;  %v3201_v21 = vpack.c.bf16 %v66_v18, %v62_v16  ;;  %v3203_v22 = vpack.c.bf16 %v63_v20, %v59_v19  ;;  %2300 = vmatprep.subr.bf16.mxu0 %v3199_v17  ;;  %v3206_v25 = vpack.c.bf16 %v65_v24, %v61_v23  ;;  %v68_v26 = vld [vmem:[#allocation2 + $0x88] sm:$0xff]  ;;  %v70_v28 = vld [vmem:[#allocation2 + $0x98] sm:$0xff]  ;;  %v67_v31 = vld [vmem:[#allocation2 + $0x80] sm:$0xff] }
  0x2d   :  { %v72_v27 = vld [vmem:[#allocation2 + $0xa8] sm:$0xff]  ;;  %v74_v30 = vld [vmem:[#allocation2 + $0xb8] sm:$0xff]  ;;  %v71_v32 = vld [vmem:[#allocation2 + $0xa0] sm:$0xff] }
  0x2e   :  { %2147 = vmatmul.mubr.msk.f32.vlgmr.msra.gmra.mrb[0].mxu0 %vm155_vm0, %v126_v12  ;;  %2332 = vmatprep.subr.bf16.mxu1 %v3201_v21  ;;  %v3210_v29 = vpack.c.bf16 %v72_v27, %v68_v26  ;;  %v127_v33 = vld [vmem:[%s3694_s0 + $0x8] sm:$0xff]  ;;  %v3217_v34 = vpack.c.bf16 %v74_v30, %v70_v28  ;;  %v3219_v35 = vpack.c.bf16 %v71_v32, %v67_v31  ;;  %v69_v36 = vld [vmem:[#allocation2 + $0x90] sm:$0xff]  ;;  %v78_v41 = vld [vmem:[#allocation2 + $0xd8] sm:$0xff] }
  0x2f   :  { %2155 = vmatmul.mubr.msk.f32.vlgmr.msra.gmra.mrb[0].mxu1 %vm155_vm0, %v126_v12  ;;  %2302 = vmatpush1.bf16.msra.mxu0 %v3203_v22  ;;  %v73_v37 = vld [vmem:[#allocation2 + $0xb0] sm:$0xff]  ;;  %v76_v39 = vld [vmem:[#allocation2 + $0xc8] sm:$0xff]  ;;  %v82_v43 = vld [vmem:[#allocation2 + $0xf8] sm:$0xff] }
  0x30   :  { %2334 = vmatpush1.bf16.msra.mxu1 %v3206_v25  ;;  %250 = vmatprep.mubr.f32.mxu0 %v3132_v0  ;;  %v3223_v38 = vpack.c.bf16 %v73_v37, %v69_v36  ;;  %v80_v40 = vld [vmem:[#allocation2 + $0xe8] sm:$0xff]  ;;  %v75_v44 = vld [vmem:[#allocation2 + $0xc0] sm:$0xff]  ;;  %v128_v46 = vld [vmem:[%s3694_s0 + $0x10] sm:$0xff]  ;;  %v3234_v47 = vpack.c.bf16 %v82_v43, %v78_v41 }
  0x31   :  { %363 = vmatprep.mubr.f32.mxu1 %v3132_v0  ;;  %2304 = vmatprep.subr.bf16.mxu0 %v3210_v29  ;;  %v3227_v42 = vpack.c.bf16 %v80_v40, %v76_v39  ;;  %v79_v45 = vld [vmem:[#allocation2 + $0xe0] sm:$0xff]  ;;  %v77_v48 = vld [vmem:[#allocation2 + $0xd0] sm:$0xff]  ;;  %v84_v51 = vld [vmem:[#allocation2 + $0x108] sm:$0xff] }
  0x32   :  { %2148 = vmatmul.mubr.msk.f32.gmra.mrb[2].mxu0 %vm155_vm0, %v127_v33  ;;  %2336 = vmatprep.subr.bf16.mxu1 %v3217_v34  ;;  %v81_v49 = vld [vmem:[#allocation2 + $0xf0] sm:$0xff]  ;;  %v3238_v50 = vpack.c.bf16 %v79_v45, %v75_v44  ;;  %v88_v52 = vld [vmem:[#allocation2 + $0x128] sm:$0xff]  ;;  %v86_v53 = vld [vmem:[#allocation2 + $0x118] sm:$0xff] }
  0x33   :  { %2156 = vmatmul.mubr.msk.f32.gmra.mrb[2].mxu1 %vm155_vm0, %v127_v33  ;;  %2306 = vmatpush1.bf16.msra.mxu0 %v3219_v35  ;;  %v3242_v54 = vpack.c.bf16 %v81_v49, %v77_v48  ;;  %v90_v55 = vld [vmem:[#allocation2 + $0x138] sm:$0xff]  ;;  %v83_v56 = vld [vmem:[#allocation2 + $0x100] sm:$0xff]  ;;  %v3246_v58 = vpack.c.bf16 %v88_v52, %v84_v51  ;;  %v85_v59 = vld [vmem:[#allocation2 + $0x110] sm:$0xff] }
  0x34   :  { %2338 = vmatpush1.bf16.msra.mxu1 %v3223_v38  ;;  %256 = vmatprep.mubr.f32.mxu0 %v3132_v0  ;;  %v87_v57 = vld [vmem:[#allocation2 + $0x120] sm:$0xff]  ;;  %v89_v60 = vld [vmem:[#allocation2 + $0x130] sm:$0xff]  ;;  %v3250_v61 = vpack.c.bf16 %v90_v55, %v86_v53  ;;  %v92_v62 = vld [vmem:[#allocation2 + $0x148] sm:$0xff] }
  0x35   :  { %369 = vmatprep.mubr.f32.mxu1 %v3132_v0  ;;  %2308 = vmatprep.subr.bf16.mxu0 %v3227_v42  ;;  %v96_v63 = vld [vmem:[#allocation2 + $0x168] sm:$0xff]  ;;  %v129_v1 = vld [vmem:[%s3694_s0 + $0x18] sm:$0xff]  ;;  %v3257_v2 = vpack.c.bf16 %v87_v57, %v83_v56  ;;  %v3261_v5 = vpack.c.bf16 %v89_v60, %v85_v59  ;;  %v91_v6 = vld [vmem:[#allocation2 + $0x140] sm:$0xff] }
  0x36   :  { %2149 = vmatmul.mubr.msk.f32.gmra.mrb[4].mxu0 %vm155_vm0, %v128_v46  ;;  %2340 = vmatprep.subr.bf16.mxu1 %v3234_v47  ;;  %v94_v3 = vld [vmem:[#allocation2 + $0x158] sm:$0xff]  ;;  %v95_v7 = vld [vmem:[#allocation2 + $0x160] sm:$0xff]  ;;  %v3265_v8 = vpack.c.bf16 %v96_v63, %v92_v62  ;;  %v93_v9 = vld [vmem:[#allocation2 + $0x150] sm:$0xff] }
  0x37   :  { %2157 = vmatmul.mubr.msk.f32.gmra.mrb[4].mxu1 %vm155_vm0, %v128_v46  ;;  %2310 = vmatpush1.bf16.msra.mxu0 %v3238_v50  ;;  %v98_v4 = vld [vmem:[#allocation2 + $0x178] sm:$0xff]  ;;  %v97_v10 = vld [vmem:[#allocation2 + $0x170] sm:$0xff]  ;;  %v100_v12 = vld [vmem:[#allocation2 + $0x188] sm:$0xff]  ;;  %v3276_v15 = vpack.c.bf16 %v95_v7, %v91_v6 }
  0x38   :  { %2342 = vmatpush1.bf16.msra.mxu1 %v3242_v54  ;;  %262 = vmatprep.mubr.f32.mxu0 %v3132_v0  ;;  %v3269_v11 = vpack.c.bf16 %v98_v4, %v94_v3  ;;  %v104_v13 = vld [vmem:[#allocation2 + $0x1a8] sm:$0xff]  ;;  %v130_v14 = vld [vmem:[%s3694_s0 + $0x20] sm:$0xff]  ;;  %v102_v16 = vld [vmem:[#allocation2 + $0x198] sm:$0xff]  ;;  %v3280_v19 = vpack.c.bf16 %v97_v10, %v93_v9  ;;  %v135_v9 = vlaneseq }
  0x39   :  { %375 = vmatprep.mubr.f32.mxu1 %v3132_v0  ;;  %2312 = vmatprep.subr.bf16.mxu0 %v3246_v58  ;;  %v106_v18 = vld [vmem:[#allocation2 + $0x1b8] sm:$0xff]  ;;  %v99_v20 = vld [vmem:[#allocation2 + $0x180] sm:$0xff]  ;;  %v3284_v24 = vpack.c.bf16 %v104_v13, %v100_v12  ;;  %v101_v26 = vld [vmem:[#allocation2 + $0x190] sm:$0xff] }
  0x3a   :  { %2150 = vmatmul.mubr.msk.f32.gmra.mrb[6].mxu0 %vm155_vm0, %v129_v1  ;;  %2344 = vmatprep.subr.bf16.mxu1 %v3250_v61  ;;  %v103_v23 = vld [vmem:[#allocation2 + $0x1a0] sm:$0xff]  ;;  %v105_v27 = vld [vmem:[#allocation2 + $0x1b0] sm:$0xff]  ;;  %v3288_v28 = vpack.c.bf16 %v106_v18, %v102_v16  ;;  %v108_v30 = vld [vmem:[#allocation2 + $0x1c8] sm:$0xff]  ;;  %v136_v10 = vshrl.u32 %v135_v9, 7 }
  0x3b   :  { %2158 = vmatmul.mubr.msk.f32.gmra.mrb[6].mxu1 %vm155_vm0, %v129_v1  ;;  %2314 = vmatpush1.bf16.msra.mxu0 %v3257_v2  ;;  %v112_v31 = vld [vmem:[#allocation2 + $0x1e8] sm:$0xff]  ;;  %v3295_v33 = vpack.c.bf16 %v103_v23, %v99_v20  ;;  %v110_v36 = vld [vmem:[#allocation2 + $0x1d8] sm:$0xff]  ;;  %v3299_v39 = vpack.c.bf16 %v105_v27, %v101_v26  ;;  %v107_v40 = vld [vmem:[#allocation2 + $0x1c0] sm:$0xff] }
  0x3c   :  { %2346 = vmatpush1.bf16.msra.mxu1 %v3261_v5  ;;  %268 = vmatprep.mubr.f32.mxu0 %v3132_v0  ;;  %v131_v32 = vld [vmem:[%s3694_s0 + $0x28] sm:$0xff]  ;;  %v114_v37 = vld [vmem:[#allocation2 + $0x1f8] sm:$0xff]  ;;  %v111_v41 = vld [vmem:[#allocation2 + $0x1e0] sm:$0xff]  ;;  %v3303_v43 = vpack.c.bf16 %v112_v31, %v108_v30  ;;  %v137_v12 = vsub.s32 0, %v136_v10  ;;  %v145_v23 = vsub.s32 2, %v136_v10 }
  0x3d   :  { %381 = vmatprep.mubr.f32.mxu1 %v3132_v0  ;;  %2316 = vmatprep.subr.bf16.mxu0 %v3265_v8  ;;  %v109_v44 = vld [vmem:[#allocation2 + $0x1d0] sm:$0xff]  ;;  %v3307_v46 = vpack.c.bf16 %v114_v37, %v110_v36  ;;  %v116_v48 = vld [vmem:[#allocation2 + $0x208] sm:$0xff]  ;;  %v3314_v52 = vpack.c.bf16 %v111_v41, %v107_v40  ;;  %v118_v53 = vld [vmem:[#allocation2 + $0x218] sm:$0xff]  ;;  %v149_v41 = vsub.s32 3, %v136_v10 }
  0x3e   :  { %2151 = vmatmul.mubr.msk.f32.gmra.mrb[8].mxu0 %vm155_vm0, %v130_v14  ;;  %2348 = vmatprep.subr.bf16.mxu1 %v3269_v11  ;;  %v113_v45 = vld [vmem:[#allocation2 + $0x1f0] sm:$0xff]  ;;  %v120_v49 = vld [vmem:[#allocation2 + $0x228] sm:$0xff]  ;;  %v122_v55 = vld [vmem:[#allocation2 + $0x238] sm:$0xff] }
  0x3f   :  { %2159 = vmatmul.mubr.msk.f32.gmra.mrb[8].mxu1 %vm155_vm0, %v130_v14  ;;  %2318 = vmatpush1.bf16.msra.mxu0 %v3276_v15  ;;  %v132_v51 = vld [vmem:[%s3694_s0 + $0x30] sm:$0xff]  ;;  %v3318_v56 = vpack.c.bf16 %v113_v45, %v109_v44  ;;  %v115_v57 = vld [vmem:[#allocation2 + $0x200] sm:$0xff]  ;;  %v3322_v60 = vpack.c.bf16 %v120_v49, %v116_v48  ;;  %v3326_v1 = vpack.c.bf16 %v122_v55, %v118_v53  ;;  %v133_v3 = vld [vmem:[%s3694_s0 + $0x38] sm:$0xff]  ;;  %v141_v14 = vsub.s32 1, %v136_v10 }
  0x40   :  { %2350 = vmatpush1.bf16.msra.mxu1 %v3280_v19  ;;  %274 = vmatprep.mubr.f32.mxu0 %v3132_v0  ;;  %v119_v59 = vld [vmem:[#allocation2 + $0x220] sm:$0xff]  ;;  %v117_v62 = vld [vmem:[#allocation2 + $0x210] sm:$0xff] }
  0x41   :  { %387 = vmatprep.mubr.f32.mxu1 %v3132_v0  ;;  %2320 = vmatprep.subr.bf16.mxu0 %v3284_v24  ;;  %v121_v63 = vld [vmem:[#allocation2 + $0x230] sm:$0xff]  ;;  %v3333_v4 = vpack.c.bf16 %v119_v59, %v115_v57  ;;  %v406_v7 = vld [vmem:[%s3695_s1] sm:$0xff] }
  0x42   :  { %2152 = vmatmul.mubr.msk.f32.gmra.mrb[10].mxu0 %vm155_vm0, %v131_v32  ;;  %2352 = vmatprep.subr.bf16.mxu1 %v3288_v28  ;;  %v3337_v6 = vpack.c.bf16 %v121_v63, %v117_v62  ;;  %v123_v13 = vld [vmem:[%s3698_s4] sm:$0xf] }
  0x43   :  { %2160 = vmatmul.mubr.msk.f32.gmra.mrb[10].mxu1 %vm155_vm0, %v131_v32  ;;  %2322 = vmatpush1.bf16.msra.mxu0 %v3295_v33  ;;  %v3391_v16 = vrot.slane %v123_v13, %v137_v12  ;;  %v3393_v18 = vrot.slane %v123_v13, %v141_v14  ;;  %v3397_v37 = vrot.slane %v123_v13, %v145_v23 }
  0x44   :  { %2354 = vmatpush1.bf16.msra.mxu1 %v3299_v39  ;;  %280 = vmatprep.mubr.f32.mxu0 %v3132_v0  ;;  %v3400_v45 = vrot.slane %v123_v13, %v149_v41 }
  0x45   :  { %393 = vmatprep.mubr.f32.mxu1 %v3132_v0  ;;  %2324 = vmatprep.subr.bf16.mxu0 %v3303_v43 }
  0x46   :  { %2153 = vmatmul.mubr.msk.f32.gmra.mrb[12].mxu0 %vm155_vm0, %v132_v51  ;;  %2356 = vmatprep.subr.bf16.mxu1 %v3307_v46 }
  0x47   :  { %2161 = vmatmul.mubr.msk.f32.gmra.mrb[12].mxu1 %vm155_vm0, %v132_v51  ;;  %2326 = vmatpush1.bf16.msra.mxu0 %v3314_v52 }
  0x48   :  { %2358 = vmatpush1.bf16.msra.mxu1 %v3318_v56  ;;  %286 = vmatprep.mubr.f32.mxu0 %v3132_v0 }
  0x49   :  { %399 = vmatprep.mubr.f32.mxu1 %v3132_v0  ;;  %2328 = vmatprep.subr.bf16.mxu0 %v3322_v60 }
  0x4a   :  { %2154 = vmatmul.mubr.msk.f32.gmra.mrb[14].mxu0 %vm155_vm0, %v133_v3  ;;  %2360 = vmatprep.subr.bf16.mxu1 %v3326_v1 }
  0x4b   :  { %2162 = vmatmul.mubr.msk.f32.gmra.mrb[14].mxu1 %vm155_vm0, %v133_v3  ;;  %2330 = vmatpush1.bf16.msra.mxu0 %v3333_v4  ;;  %v407_v3 = vld [vmem:[%s3695_s1 + $0x8] sm:$0xff] }
  0x4c   :  { %2362 = vmatpush1.bf16.msra.mxu1 %v3337_v6  ;;  %472 = vmatprep.mubr.f32.mxu0 %v3132_v0 }
  0x4d   :  { %543 = vmatprep.mubr.f32.mxu1 %v3132_v0  ;;  %2364 = vmatprep.subr.bf16.mxu0 %v3199_v17 }
  0x4e   :  { %473 = vmatmul.mubr.f32.vlgmr.msra.gmra.mrb[0].mxu0 %v406_v7  ;;  %2396 = vmatprep.subr.bf16.mxu1 %v3201_v21 }
  0x4f   :  { %544 = vmatmul.mubr.f32.vlgmr.msra.gmra.mrb[0].mxu1 %v406_v7  ;;  %2366 = vmatpush1.bf16.msra.mxu0 %v3203_v22 }
  0x50   :  { %2398 = vmatpush1.bf16.msra.mxu1 %v3206_v25  ;;  %2368 = vmatprep.subr.bf16.mxu0 %v3210_v29 }
  0x51   :  { %2400 = vmatprep.subr.bf16.mxu1 %v3217_v34  ;;  %642 = vmatprep.mubr.f32.mxu0 %v3132_v0 }
  0x52   :  { %713 = vmatprep.mubr.f32.mxu1 %v3132_v0 }
  0x53   :  { %2370 = vmatpush1.bf16.msra.mxu0 %v3219_v35 }
  0x54   :  { %2402 = vmatpush1.bf16.msra.mxu1 %v3223_v38  ;;  %2372 = vmatprep.subr.bf16.mxu0 %v3227_v42 }
  0x55   :  { %2404 = vmatprep.subr.bf16.mxu1 %v3234_v47 }
  0x57   :  { %2374 = vmatpush1.bf16.msra.mxu0 %v3238_v50 }
  0x58   :  { %2406 = vmatpush1.bf16.msra.mxu1 %v3242_v54  ;;  %2376 = vmatprep.subr.bf16.mxu0 %v3246_v58 }
  0x59   :  { %2408 = vmatprep.subr.bf16.mxu1 %v3250_v61 }
  0x5b   :  { %2378 = vmatpush1.bf16.msra.mxu0 %v3257_v2 }
  0x5c   :  { %2410 = vmatpush1.bf16.msra.mxu1 %v3261_v5  ;;  %2380 = vmatprep.subr.bf16.mxu0 %v3265_v8 }
  0x5d   :  { %2412 = vmatprep.subr.bf16.mxu1 %v3269_v11 }
  0x5f   :  { %2382 = vmatpush1.bf16.msra.mxu0 %v3276_v15 }
  0x60   :  { %2414 = vmatpush1.bf16.msra.mxu1 %v3280_v19  ;;  %2384 = vmatprep.subr.bf16.mxu0 %v3284_v24 }
  0x61   :  { %2416 = vmatprep.subr.bf16.mxu1 %v3288_v28 }
  0x63   :  { %2386 = vmatpush1.bf16.msra.mxu0 %v3295_v33 }
  0x64   :  { %2418 = vmatpush1.bf16.msra.mxu1 %v3299_v39  ;;  %2388 = vmatprep.subr.bf16.mxu0 %v3303_v43 }
  0x65   :  { %2420 = vmatprep.subr.bf16.mxu1 %v3307_v46 }
  0x67   :  { %2390 = vmatpush1.bf16.msra.mxu0 %v3314_v52 }
  0x68   :  { %2422 = vmatpush1.bf16.msra.mxu1 %v3318_v56  ;;  %2392 = vmatprep.subr.bf16.mxu0 %v3322_v60 }
  0x69   :  { %2424 = vmatprep.subr.bf16.mxu1 %v3326_v1 }
  0x6b   :  { %2394 = vmatpush1.bf16.msra.mxu0 %v3333_v4 }
  0x6c   :  { %2426 = vmatpush1.bf16.msra.mxu1 %v3337_v6  ;;  %2428 = vmatprep.subr.bf16.mxu0 %v3199_v17 }
  0x6d   :  { %2460 = vmatprep.subr.bf16.mxu1 %v3201_v21 }
 0x121   :  { %v474_v20 = vpop.f32.mrb[0].mxu0 }
 0x122   :  { %v2867_v26 = vadd.f32 %v474_v20, %v3391_v16  ;;  %v545_v27 = vpop.f32.mrb[0].mxu1  ;;  %v476_v30 = vpop.f32.mrb[1].mxu0 }
 0x123   :  { %v2868_v31 = vadd.f32 %v476_v30, %v3393_v18  ;;  %v547_v32 = vpop.f32.mrb[1].mxu1  ;;  %v2883_v44 = vadd.f32 %v545_v27, %v3397_v37 }
 0x124   :  { %v2163_v36 = vmul.f32 -1.442695, %v2867_v26  ;;  %v2884_v49 = vadd.f32 %v547_v32, %v3400_v45 }
 0x125   :  { %v2164_v40 = vmul.f32 -1.442695, %v2868_v31  ;;  %v2165_v48 = vmul.f32 -1.442695, %v2883_v44 }
 0x126   :  { %2940 = vpow2.f32 %v2163_v36 }
 0x127   :  { %2942 = vpow2.f32 %v2164_v40 }
 0x128   :  { %2944 = vpow2.f32 %v2165_v48 }
 0x129   :  { %2946 = vtanh.f32 %v2884_v49 }
 0x130   :  { %v2941_v51 = vpop.eup %2940 }
 0x131   :  { %v563_v53 = vadd.f32 1.0, %v2941_v51  ;;  %v2943_v55 = vpop.eup %2942 }
 0x132   :  { %v564_v57 = vadd.f32 1.0, %v2943_v55  ;;  %v2945_v59 = vpop.eup %2944 }
 0x133   :  { %2948 = vrcp.f32 %v563_v53  ;;  %v2947_v62 = vpop.eup %2946  ;;  %v565_v12 = vadd.f32 1.0, %v2945_v59 }
 0x134   :  { %2950 = vrcp.f32 %v564_v57 }
 0x135   :  { %2952 = vrcp.f32 %v565_v12 }
 0x13d   :  { %v2949_v63 = vpop.eup %2948 }
 0x13e   :  { %v574_v7 = vmul.f32 %v2949_v63, %v2947_v62  ;;  %v2951_v10 = vpop.eup %2950 }
 0x13f   :  { %v573_v13 = vmul.f32 %v2951_v10, %v407_v3  ;;  %v2953_v20 = vpop.eup %2952 }
 0x141   :  { %v3406_v14 = vadd.f32 %v574_v7, %v573_v13 }
 0x143   :  { %2954 = vtanh.f32 %v3406_v14 }
 0x14d   :  { %v2955_v23 = vpop.eup %2954 }
 0x14e   :  { %v577_v26 = vmul.f32 %v2955_v23, %v2953_v20 }
 0x150   :  { %643 = vmatmul.mubr.f32.vlgmr.msra.gmra.mrb[2].mxu0 %v577_v26  ;;  %714 = vmatmul.mubr.f32.vlgmr.msra.gmra.mrb[2].mxu1 %v577_v26 }
 0x151   :  { %2430 = vmatpush1.bf16.msra.mxu0 %v3203_v22  ;;  %2462 = vmatpush1.bf16.msra.mxu1 %v3206_v25 }
 0x152   :  { %2432 = vmatprep.subr.bf16.mxu0 %v3210_v29  ;;  %2464 = vmatprep.subr.bf16.mxu1 %v3217_v34 }
 0x153   :  { %812 = vmatprep.mubr.f32.mxu0 %v3132_v0  ;;  %883 = vmatprep.mubr.f32.mxu1 %v3132_v0 }
 0x155   :  { %2434 = vmatpush1.bf16.msra.mxu0 %v3219_v35  ;;  %2466 = vmatpush1.bf16.msra.mxu1 %v3223_v38 }
 0x156   :  { %2436 = vmatprep.subr.bf16.mxu0 %v3227_v42  ;;  %2468 = vmatprep.subr.bf16.mxu1 %v3234_v47 }
 0x159   :  { %2438 = vmatpush1.bf16.msra.mxu0 %v3238_v50  ;;  %2470 = vmatpush1.bf16.msra.mxu1 %v3242_v54 }
 0x15a   :  { %2440 = vmatprep.subr.bf16.mxu0 %v3246_v58  ;;  %2472 = vmatprep.subr.bf16.mxu1 %v3250_v61 }
 0x15d   :  { %2442 = vmatpush1.bf16.msra.mxu0 %v3257_v2  ;;  %2474 = vmatpush1.bf16.msra.mxu1 %v3261_v5 }
 0x15e   :  { %2444 = vmatprep.subr.bf16.mxu0 %v3265_v8  ;;  %2476 = vmatprep.subr.bf16.mxu1 %v3269_v11 }
 0x161   :  { %2446 = vmatpush1.bf16.msra.mxu0 %v3276_v15  ;;  %2478 = vmatpush1.bf16.msra.mxu1 %v3280_v19 }
 0x162   :  { %2448 = vmatprep.subr.bf16.mxu0 %v3284_v24  ;;  %2480 = vmatprep.subr.bf16.mxu1 %v3288_v28 }
 0x165   :  { %2450 = vmatpush1.bf16.msra.mxu0 %v3295_v33  ;;  %2482 = vmatpush1.bf16.msra.mxu1 %v3299_v39 }
 0x166   :  { %2452 = vmatprep.subr.bf16.mxu0 %v3303_v43  ;;  %2484 = vmatprep.subr.bf16.mxu1 %v3307_v46 }
 0x169   :  { %2454 = vmatpush1.bf16.msra.mxu0 %v3314_v52  ;;  %2486 = vmatpush1.bf16.msra.mxu1 %v3318_v56 }
 0x16a   :  { %2456 = vmatprep.subr.bf16.mxu0 %v3322_v60  ;;  %2488 = vmatprep.subr.bf16.mxu1 %v3326_v1 }
 0x16d   :  { %2458 = vmatpush1.bf16.msra.mxu0 %v3333_v4  ;;  %2490 = vmatpush1.bf16.msra.mxu1 %v3337_v6 }
 0x16e   :  { %2492 = vmatprep.subr.bf16.mxu0 %v3199_v17  ;;  %2524 = vmatprep.subr.bf16.mxu1 %v3201_v21 }
 0x223   :  { %v644_v27 = vpop.f32.mrb[2].mxu0  ;;  %v715_v30 = vpop.f32.mrb[2].mxu1 }
 0x224   :  { %v2869_v31 = vadd.f32 %v644_v27, %v3391_v16  ;;  %v646_v32 = vpop.f32.mrb[3].mxu0  ;;  %v717_v36 = vpop.f32.mrb[3].mxu1  ;;  %v2885_v48 = vadd.f32 %v715_v30, %v3397_v37 }
 0x225   :  { %v2870_v40 = vadd.f32 %v646_v32, %v3393_v18  ;;  %v2886_v49 = vadd.f32 %v717_v36, %v3400_v45 }
 0x226   :  { %v2166_v41 = vmul.f32 -1.442695, %v2869_v31  ;;  %v2168_v51 = vmul.f32 -1.442695, %v2885_v48 }
 0x227   :  { %v2167_v44 = vmul.f32 -1.442695, %v2870_v40 }
 0x228   :  { %2956 = vpow2.f32 %v2166_v41 }
 0x229   :  { %2958 = vpow2.f32 %v2167_v44 }
 0x22a   :  { %2960 = vtanh.f32 %v2886_v49 }
 0x22b   :  { %2962 = vpow2.f32 %v2168_v51 }
 0x232   :  { %v2957_v53 = vpop.eup %2956 }
 0x233   :  { %v733_v55 = vadd.f32 1.0, %v2957_v53  ;;  %v2959_v57 = vpop.eup %2958 }
 0x234   :  { %v734_v59 = vadd.f32 1.0, %v2959_v57  ;;  %v2961_v62 = vpop.eup %2960 }
 0x235   :  { %2964 = vrcp.f32 %v733_v55  ;;  %v2963_v63 = vpop.eup %2962 }
 0x236   :  { %2966 = vrcp.f32 %v734_v59  ;;  %v735_v12 = vadd.f32 1.0, %v2963_v63 }
 0x238   :  { %2968 = vrcp.f32 %v735_v12 }
 0x23f   :  { %v2965_v3 = vpop.eup %2964 }
 0x240   :  { %v744_v7 = vmul.f32 %v2965_v3, %v2961_v62  ;;  %v2967_v10 = vpop.eup %2966 }
 0x241   :  { %v743_v13 = vmul.f32 %v2967_v10, %v3406_v14 }
 0x242   :  { %v2969_v23 = vpop.eup %2968 }
 0x243   :  { %v3448_v20 = vadd.f32 %v744_v7, %v743_v13 }
 0x245   :  { %2970 = vtanh.f32 %v3448_v20 }
 0x24f   :  { %v2971_v26 = vpop.eup %2970 }
 0x250   :  { %v747_v27 = vmul.f32 %v2971_v26, %v2969_v23 }
 0x252   :  { %813 = vmatmul.mubr.f32.vlgmr.msra.gmra.mrb[4].mxu0 %v747_v27  ;;  %884 = vmatmul.mubr.f32.vlgmr.msra.gmra.mrb[4].mxu1 %v747_v27 }
 0x253   :  { %2494 = vmatpush1.bf16.msra.mxu0 %v3203_v22  ;;  %2526 = vmatpush1.bf16.msra.mxu1 %v3206_v25 }
 0x254   :  { %2496 = vmatprep.subr.bf16.mxu0 %v3210_v29  ;;  %2528 = vmatprep.subr.bf16.mxu1 %v3217_v34 }
 0x255   :  { %982 = vmatprep.mubr.f32.mxu0 %v3132_v0  ;;  %1053 = vmatprep.mubr.f32.mxu1 %v3132_v0 }
 0x257   :  { %2498 = vmatpush1.bf16.msra.mxu0 %v3219_v35  ;;  %2530 = vmatpush1.bf16.msra.mxu1 %v3223_v38 }
 0x258   :  { %2500 = vmatprep.subr.bf16.mxu0 %v3227_v42  ;;  %2532 = vmatprep.subr.bf16.mxu1 %v3234_v47 }
 0x25b   :  { %2502 = vmatpush1.bf16.msra.mxu0 %v3238_v50  ;;  %2534 = vmatpush1.bf16.msra.mxu1 %v3242_v54 }
 0x25c   :  { %2504 = vmatprep.subr.bf16.mxu0 %v3246_v58  ;;  %2536 = vmatprep.subr.bf16.mxu1 %v3250_v61 }
 0x25f   :  { %2506 = vmatpush1.bf16.msra.mxu0 %v3257_v2  ;;  %2538 = vmatpush1.bf16.msra.mxu1 %v3261_v5 }
 0x260   :  { %2508 = vmatprep.subr.bf16.mxu0 %v3265_v8  ;;  %2540 = vmatprep.subr.bf16.mxu1 %v3269_v11 }
 0x263   :  { %2510 = vmatpush1.bf16.msra.mxu0 %v3276_v15  ;;  %2542 = vmatpush1.bf16.msra.mxu1 %v3280_v19 }
 0x264   :  { %2512 = vmatprep.subr.bf16.mxu0 %v3284_v24  ;;  %2544 = vmatprep.subr.bf16.mxu1 %v3288_v28 }
 0x267   :  { %2514 = vmatpush1.bf16.msra.mxu0 %v3295_v33  ;;  %2546 = vmatpush1.bf16.msra.mxu1 %v3299_v39 }
 0x268   :  { %2516 = vmatprep.subr.bf16.mxu0 %v3303_v43  ;;  %2548 = vmatprep.subr.bf16.mxu1 %v3307_v46 }
 0x26b   :  { %2518 = vmatpush1.bf16.msra.mxu0 %v3314_v52  ;;  %2550 = vmatpush1.bf16.msra.mxu1 %v3318_v56 }
 0x26c   :  { %2520 = vmatprep.subr.bf16.mxu0 %v3322_v60  ;;  %2552 = vmatprep.subr.bf16.mxu1 %v3326_v1 }
 0x26f   :  { %2522 = vmatpush1.bf16.msra.mxu0 %v3333_v4  ;;  %2554 = vmatpush1.bf16.msra.mxu1 %v3337_v6 }
 0x270   :  { %2556 = vmatprep.subr.bf16.mxu0 %v3199_v17  ;;  %2588 = vmatprep.subr.bf16.mxu1 %v3201_v21 }
 0x325   :  { %v814_v14 = vpop.f32.mrb[4].mxu0  ;;  %v885_v30 = vpop.f32.mrb[4].mxu1 }
 0x326   :  { %v2871_v31 = vadd.f32 %v814_v14, %v3391_v16  ;;  %v816_v32 = vpop.f32.mrb[5].mxu0  ;;  %v887_v36 = vpop.f32.mrb[5].mxu1  ;;  %v2887_v48 = vadd.f32 %v885_v30, %v3397_v37 }
 0x327   :  { %v2872_v40 = vadd.f32 %v816_v32, %v3393_v18  ;;  %v2888_v49 = vadd.f32 %v887_v36, %v3400_v45 }
 0x328   :  { %v2169_v41 = vmul.f32 -1.442695, %v2871_v31  ;;  %v2171_v51 = vmul.f32 -1.442695, %v2887_v48 }
 0x329   :  { %v2170_v44 = vmul.f32 -1.442695, %v2872_v40 }
 0x32a   :  { %2972 = vpow2.f32 %v2169_v41 }
 0x32b   :  { %2974 = vpow2.f32 %v2170_v44 }
 0x32c   :  { %2976 = vtanh.f32 %v2888_v49 }
 0x32d   :  { %2978 = vpow2.f32 %v2171_v51 }
 0x334   :  { %v2973_v53 = vpop.eup %2972 }
 0x335   :  { %v903_v55 = vadd.f32 1.0, %v2973_v53  ;;  %v2975_v57 = vpop.eup %2974 }
 0x336   :  { %v904_v59 = vadd.f32 1.0, %v2975_v57  ;;  %v2977_v62 = vpop.eup %2976 }
 0x337   :  { %2980 = vrcp.f32 %v903_v55  ;;  %v2979_v63 = vpop.eup %2978 }
 0x338   :  { %2982 = vrcp.f32 %v904_v59  ;;  %v905_v12 = vadd.f32 1.0, %v2979_v63 }
 0x33a   :  { %2984 = vrcp.f32 %v905_v12 }
 0x341   :  { %v2981_v3 = vpop.eup %2980 }
 0x342   :  { %v914_v7 = vmul.f32 %v2981_v3, %v2977_v62  ;;  %v2983_v10 = vpop.eup %2982 }
 0x343   :  { %v913_v13 = vmul.f32 %v2983_v10, %v3448_v20 }
 0x344   :  { %v2985_v26 = vpop.eup %2984 }
 0x345   :  { %v3490_v23 = vadd.f32 %v914_v7, %v913_v13 }
 0x347   :  { %2986 = vtanh.f32 %v3490_v23 }
 0x351   :  { %v2987_v27 = vpop.eup %2986 }
 0x352   :  { %v917_v14 = vmul.f32 %v2987_v27, %v2985_v26 }
 0x354   :  { %983 = vmatmul.mubr.f32.vlgmr.msra.gmra.mrb[6].mxu0 %v917_v14  ;;  %1054 = vmatmul.mubr.f32.vlgmr.msra.gmra.mrb[6].mxu1 %v917_v14 }
 0x355   :  { %2558 = vmatpush1.bf16.msra.mxu0 %v3203_v22  ;;  %2590 = vmatpush1.bf16.msra.mxu1 %v3206_v25 }
 0x356   :  { %2560 = vmatprep.subr.bf16.mxu0 %v3210_v29  ;;  %2592 = vmatprep.subr.bf16.mxu1 %v3217_v34 }
 0x357   :  { %1152 = vmatprep.mubr.f32.mxu0 %v3132_v0  ;;  %1223 = vmatprep.mubr.f32.mxu1 %v3132_v0 }
 0x359   :  { %2562 = vmatpush1.bf16.msra.mxu0 %v3219_v35  ;;  %2594 = vmatpush1.bf16.msra.mxu1 %v3223_v38 }
 0x35a   :  { %2564 = vmatprep.subr.bf16.mxu0 %v3227_v42  ;;  %2596 = vmatprep.subr.bf16.mxu1 %v3234_v47 }
 0x35d   :  { %2566 = vmatpush1.bf16.msra.mxu0 %v3238_v50  ;;  %2598 = vmatpush1.bf16.msra.mxu1 %v3242_v54 }
 0x35e   :  { %2568 = vmatprep.subr.bf16.mxu0 %v3246_v58  ;;  %2600 = vmatprep.subr.bf16.mxu1 %v3250_v61 }
 0x361   :  { %2570 = vmatpush1.bf16.msra.mxu0 %v3257_v2  ;;  %2602 = vmatpush1.bf16.msra.mxu1 %v3261_v5 }
 0x362   :  { %2572 = vmatprep.subr.bf16.mxu0 %v3265_v8  ;;  %2604 = vmatprep.subr.bf16.mxu1 %v3269_v11 }
 0x365   :  { %2574 = vmatpush1.bf16.msra.mxu0 %v3276_v15  ;;  %2606 = vmatpush1.bf16.msra.mxu1 %v3280_v19 }
 0x366   :  { %2576 = vmatprep.subr.bf16.mxu0 %v3284_v24  ;;  %2608 = vmatprep.subr.bf16.mxu1 %v3288_v28 }
 0x369   :  { %2578 = vmatpush1.bf16.msra.mxu0 %v3295_v33  ;;  %2610 = vmatpush1.bf16.msra.mxu1 %v3299_v39 }
 0x36a   :  { %2580 = vmatprep.subr.bf16.mxu0 %v3303_v43  ;;  %2612 = vmatprep.subr.bf16.mxu1 %v3307_v46 }
 0x36d   :  { %2582 = vmatpush1.bf16.msra.mxu0 %v3314_v52  ;;  %2614 = vmatpush1.bf16.msra.mxu1 %v3318_v56 }
 0x36e   :  { %2584 = vmatprep.subr.bf16.mxu0 %v3322_v60  ;;  %2616 = vmatprep.subr.bf16.mxu1 %v3326_v1 }
 0x371   :  { %2586 = vmatpush1.bf16.msra.mxu0 %v3333_v4  ;;  %2618 = vmatpush1.bf16.msra.mxu1 %v3337_v6 }
 0x372   :  { %2620 = vmatprep.subr.bf16.mxu0 %v3199_v17  ;;  %2652 = vmatprep.subr.bf16.mxu1 %v3201_v21 }
 0x427   :  { %v984_v20 = vpop.f32.mrb[6].mxu0  ;;  %v1055_v30 = vpop.f32.mrb[6].mxu1 }
 0x428   :  { %v2873_v31 = vadd.f32 %v984_v20, %v3391_v16  ;;  %v986_v32 = vpop.f32.mrb[7].mxu0  ;;  %v1057_v36 = vpop.f32.mrb[7].mxu1  ;;  %v2889_v48 = vadd.f32 %v1055_v30, %v3397_v37 }
 0x429   :  { %v2874_v40 = vadd.f32 %v986_v32, %v3393_v18  ;;  %v2890_v49 = vadd.f32 %v1057_v36, %v3400_v45 }
 0x42a   :  { %v2172_v41 = vmul.f32 -1.442695, %v2873_v31  ;;  %v2174_v51 = vmul.f32 -1.442695, %v2889_v48 }
 0x42b   :  { %v2173_v44 = vmul.f32 -1.442695, %v2874_v40 }
 0x42c   :  { %2988 = vpow2.f32 %v2172_v41 }
 0x42d   :  { %2990 = vpow2.f32 %v2173_v44 }
 0x42e   :  { %2992 = vtanh.f32 %v2890_v49 }
 0x42f   :  { %2994 = vpow2.f32 %v2174_v51 }
 0x436   :  { %v2989_v53 = vpop.eup %2988 }
 0x437   :  { %v1073_v55 = vadd.f32 1.0, %v2989_v53  ;;  %v2991_v57 = vpop.eup %2990 }
 0x438   :  { %v1074_v59 = vadd.f32 1.0, %v2991_v57  ;;  %v2993_v62 = vpop.eup %2992 }
 0x439   :  { %2996 = vrcp.f32 %v1073_v55  ;;  %v2995_v63 = vpop.eup %2994 }
 0x43a   :  { %2998 = vrcp.f32 %v1074_v59  ;;  %v1075_v12 = vadd.f32 1.0, %v2995_v63 }
 0x43c   :  { %3000 = vrcp.f32 %v1075_v12 }
 0x443   :  { %v2997_v3 = vpop.eup %2996 }
 0x444   :  { %v1084_v7 = vmul.f32 %v2997_v3, %v2993_v62  ;;  %v2999_v10 = vpop.eup %2998 }
 0x445   :  { %v1083_v13 = vmul.f32 %v2999_v10, %v3490_v23 }
 0x446   :  { %v3001_v27 = vpop.eup %3000 }
 0x447   :  { %v3532_v26 = vadd.f32 %v1084_v7, %v1083_v13 }
 0x449   :  { %3002 = vtanh.f32 %v3532_v26 }
 0x453   :  { %v3003_v14 = vpop.eup %3002 }
 0x454   :  { %v1087_v20 = vmul.f32 %v3003_v14, %v3001_v27 }
 0x456   :  { %1153 = vmatmul.mubr.f32.vlgmr.msra.gmra.mrb[8].mxu0 %v1087_v20  ;;  %1224 = vmatmul.mubr.f32.vlgmr.msra.gmra.mrb[8].mxu1 %v1087_v20 }
 0x457   :  { %2622 = vmatpush1.bf16.msra.mxu0 %v3203_v22  ;;  %2654 = vmatpush1.bf16.msra.mxu1 %v3206_v25 }
 0x458   :  { %2624 = vmatprep.subr.bf16.mxu0 %v3210_v29  ;;  %2656 = vmatprep.subr.bf16.mxu1 %v3217_v34 }
 0x459   :  { %1322 = vmatprep.mubr.f32.mxu0 %v3132_v0  ;;  %1393 = vmatprep.mubr.f32.mxu1 %v3132_v0 }
 0x45b   :  { %2626 = vmatpush1.bf16.msra.mxu0 %v3219_v35  ;;  %2658 = vmatpush1.bf16.msra.mxu1 %v3223_v38 }
 0x45c   :  { %2628 = vmatprep.subr.bf16.mxu0 %v3227_v42  ;;  %2660 = vmatprep.subr.bf16.mxu1 %v3234_v47 }
 0x45f   :  { %2630 = vmatpush1.bf16.msra.mxu0 %v3238_v50  ;;  %2662 = vmatpush1.bf16.msra.mxu1 %v3242_v54 }
 0x460   :  { %2632 = vmatprep.subr.bf16.mxu0 %v3246_v58  ;;  %2664 = vmatprep.subr.bf16.mxu1 %v3250_v61 }
 0x463   :  { %2634 = vmatpush1.bf16.msra.mxu0 %v3257_v2  ;;  %2666 = vmatpush1.bf16.msra.mxu1 %v3261_v5 }
 0x464   :  { %2636 = vmatprep.subr.bf16.mxu0 %v3265_v8  ;;  %2668 = vmatprep.subr.bf16.mxu1 %v3269_v11 }
 0x467   :  { %2638 = vmatpush1.bf16.msra.mxu0 %v3276_v15  ;;  %2670 = vmatpush1.bf16.msra.mxu1 %v3280_v19 }
 0x468   :  { %2640 = vmatprep.subr.bf16.mxu0 %v3284_v24  ;;  %2672 = vmatprep.subr.bf16.mxu1 %v3288_v28 }
 0x46b   :  { %2642 = vmatpush1.bf16.msra.mxu0 %v3295_v33  ;;  %2674 = vmatpush1.bf16.msra.mxu1 %v3299_v39 }
 0x46c   :  { %2644 = vmatprep.subr.bf16.mxu0 %v3303_v43  ;;  %2676 = vmatprep.subr.bf16.mxu1 %v3307_v46 }
 0x46f   :  { %2646 = vmatpush1.bf16.msra.mxu0 %v3314_v52  ;;  %2678 = vmatpush1.bf16.msra.mxu1 %v3318_v56 }
 0x470   :  { %2648 = vmatprep.subr.bf16.mxu0 %v3322_v60  ;;  %2680 = vmatprep.subr.bf16.mxu1 %v3326_v1 }
 0x473   :  { %2650 = vmatpush1.bf16.msra.mxu0 %v3333_v4  ;;  %2682 = vmatpush1.bf16.msra.mxu1 %v3337_v6 }
 0x474   :  { %2684 = vmatprep.subr.bf16.mxu0 %v3199_v17  ;;  %2716 = vmatprep.subr.bf16.mxu1 %v3201_v21 }
 0x529   :  { %v1154_v23 = vpop.f32.mrb[8].mxu0  ;;  %v1225_v30 = vpop.f32.mrb[8].mxu1 }
 0x52a   :  { %v2875_v31 = vadd.f32 %v1154_v23, %v3391_v16  ;;  %v1156_v32 = vpop.f32.mrb[9].mxu0  ;;  %v1227_v36 = vpop.f32.mrb[9].mxu1  ;;  %v2891_v48 = vadd.f32 %v1225_v30, %v3397_v37 }
 0x52b   :  { %v2876_v40 = vadd.f32 %v1156_v32, %v3393_v18  ;;  %v2892_v49 = vadd.f32 %v1227_v36, %v3400_v45 }
 0x52c   :  { %v2175_v41 = vmul.f32 -1.442695, %v2875_v31  ;;  %v2177_v51 = vmul.f32 -1.442695, %v2891_v48 }
 0x52d   :  { %v2176_v44 = vmul.f32 -1.442695, %v2876_v40 }
 0x52e   :  { %3004 = vpow2.f32 %v2175_v41 }
 0x52f   :  { %3006 = vpow2.f32 %v2176_v44 }
 0x530   :  { %3008 = vtanh.f32 %v2892_v49 }
 0x531   :  { %3010 = vpow2.f32 %v2177_v51 }
 0x538   :  { %v3005_v53 = vpop.eup %3004 }
 0x539   :  { %v1243_v55 = vadd.f32 1.0, %v3005_v53  ;;  %v3007_v57 = vpop.eup %3006 }
 0x53a   :  { %v1244_v59 = vadd.f32 1.0, %v3007_v57  ;;  %v3009_v62 = vpop.eup %3008 }
 0x53b   :  { %3012 = vrcp.f32 %v1243_v55  ;;  %v3011_v63 = vpop.eup %3010 }
 0x53c   :  { %3014 = vrcp.f32 %v1244_v59  ;;  %v1245_v12 = vadd.f32 1.0, %v3011_v63 }
 0x53e   :  { %3016 = vrcp.f32 %v1245_v12 }
 0x545   :  { %v3013_v3 = vpop.eup %3012 }
 0x546   :  { %v1254_v7 = vmul.f32 %v3013_v3, %v3009_v62  ;;  %v3015_v10 = vpop.eup %3014 }
 0x547   :  { %v1253_v13 = vmul.f32 %v3015_v10, %v3532_v26 }
 0x548   :  { %v3017_v14 = vpop.eup %3016 }
 0x549   :  { %v3574_v27 = vadd.f32 %v1254_v7, %v1253_v13 }
 0x54b   :  { %3018 = vtanh.f32 %v3574_v27 }
 0x555   :  { %v3019_v20 = vpop.eup %3018 }
 0x556   :  { %v1257_v23 = vmul.f32 %v3019_v20, %v3017_v14 }
 0x558   :  { %1323 = vmatmul.mubr.f32.vlgmr.msra.gmra.mrb[10].mxu0 %v1257_v23  ;;  %1394 = vmatmul.mubr.f32.vlgmr.msra.gmra.mrb[10].mxu1 %v1257_v23 }
 0x559   :  { %2686 = vmatpush1.bf16.msra.mxu0 %v3203_v22  ;;  %2718 = vmatpush1.bf16.msra.mxu1 %v3206_v25 }
 0x55a   :  { %2688 = vmatprep.subr.bf16.mxu0 %v3210_v29  ;;  %2720 = vmatprep.subr.bf16.mxu1 %v3217_v34 }
 0x55b   :  { %1492 = vmatprep.mubr.f32.mxu0 %v3132_v0  ;;  %1563 = vmatprep.mubr.f32.mxu1 %v3132_v0 }
 0x55d   :  { %2690 = vmatpush1.bf16.msra.mxu0 %v3219_v35  ;;  %2722 = vmatpush1.bf16.msra.mxu1 %v3223_v38 }
 0x55e   :  { %2692 = vmatprep.subr.bf16.mxu0 %v3227_v42  ;;  %2724 = vmatprep.subr.bf16.mxu1 %v3234_v47 }
 0x561   :  { %2694 = vmatpush1.bf16.msra.mxu0 %v3238_v50  ;;  %2726 = vmatpush1.bf16.msra.mxu1 %v3242_v54 }
 0x562   :  { %2696 = vmatprep.subr.bf16.mxu0 %v3246_v58  ;;  %2728 = vmatprep.subr.bf16.mxu1 %v3250_v61 }
 0x565   :  { %2698 = vmatpush1.bf16.msra.mxu0 %v3257_v2  ;;  %2730 = vmatpush1.bf16.msra.mxu1 %v3261_v5 }
 0x566   :  { %2700 = vmatprep.subr.bf16.mxu0 %v3265_v8  ;;  %2732 = vmatprep.subr.bf16.mxu1 %v3269_v11 }
 0x569   :  { %2702 = vmatpush1.bf16.msra.mxu0 %v3276_v15  ;;  %2734 = vmatpush1.bf16.msra.mxu1 %v3280_v19 }
 0x56a   :  { %2704 = vmatprep.subr.bf16.mxu0 %v3284_v24  ;;  %2736 = vmatprep.subr.bf16.mxu1 %v3288_v28 }
 0x56d   :  { %2706 = vmatpush1.bf16.msra.mxu0 %v3295_v33  ;;  %2738 = vmatpush1.bf16.msra.mxu1 %v3299_v39 }
 0x56e   :  { %2708 = vmatprep.subr.bf16.mxu0 %v3303_v43  ;;  %2740 = vmatprep.subr.bf16.mxu1 %v3307_v46 }
 0x571   :  { %2710 = vmatpush1.bf16.msra.mxu0 %v3314_v52  ;;  %2742 = vmatpush1.bf16.msra.mxu1 %v3318_v56 }
 0x572   :  { %2712 = vmatprep.subr.bf16.mxu0 %v3322_v60  ;;  %2744 = vmatprep.subr.bf16.mxu1 %v3326_v1 }
 0x575   :  { %2714 = vmatpush1.bf16.msra.mxu0 %v3333_v4  ;;  %2746 = vmatpush1.bf16.msra.mxu1 %v3337_v6 }
 0x576   :  { %2748 = vmatprep.subr.bf16.mxu0 %v3199_v17  ;;  %2780 = vmatprep.subr.bf16.mxu1 %v3201_v21 }
 0x62b   :  { %v1324_v26 = vpop.f32.mrb[10].mxu0  ;;  %v1395_v30 = vpop.f32.mrb[10].mxu1 }
 0x62c   :  { %v2877_v31 = vadd.f32 %v1324_v26, %v3391_v16  ;;  %v1326_v32 = vpop.f32.mrb[11].mxu0  ;;  %v1397_v36 = vpop.f32.mrb[11].mxu1  ;;  %v2893_v48 = vadd.f32 %v1395_v30, %v3397_v37 }
 0x62d   :  { %v2878_v40 = vadd.f32 %v1326_v32, %v3393_v18  ;;  %v2894_v49 = vadd.f32 %v1397_v36, %v3400_v45 }
 0x62e   :  { %v2178_v41 = vmul.f32 -1.442695, %v2877_v31  ;;  %v2180_v51 = vmul.f32 -1.442695, %v2893_v48 }
 0x62f   :  { %v2179_v44 = vmul.f32 -1.442695, %v2878_v40 }
 0x630   :  { %3020 = vpow2.f32 %v2178_v41 }
 0x631   :  { %3022 = vpow2.f32 %v2179_v44 }
 0x632   :  { %3024 = vtanh.f32 %v2894_v49 }
 0x633   :  { %3026 = vpow2.f32 %v2180_v51 }
 0x63a   :  { %v3021_v17 = vpop.eup %3020 }
 0x63b   :  { %v1413_v53 = vadd.f32 1.0, %v3021_v17  ;;  %v3023_v21 = vpop.eup %3022 }
 0x63c   :  { %v1414_v55 = vadd.f32 1.0, %v3023_v21  ;;  %v3025_v57 = vpop.eup %3024 }
 0x63d   :  { %3028 = vrcp.f32 %v1413_v53  ;;  %v3027_v59 = vpop.eup %3026 }
 0x63e   :  { %3030 = vrcp.f32 %v1414_v55  ;;  %v1415_v7 = vadd.f32 1.0, %v3027_v59 }
 0x640   :  { %3032 = vrcp.f32 %v1415_v7 }
 0x647   :  { %v3029_v62 = vpop.eup %3028 }
 0x648   :  { %v1424_v63 = vmul.f32 %v3029_v62, %v3025_v57  ;;  %v3031_v3 = vpop.eup %3030 }
 0x649   :  { %v1423_v10 = vmul.f32 %v3031_v3, %v3574_v27 }
 0x64a   :  { %v3033_v13 = vpop.eup %3032 }
 0x64b   :  { %v3616_v12 = vadd.f32 %v1424_v63, %v1423_v10 }
 0x64d   :  { %3034 = vtanh.f32 %v3616_v12 }
 0x657   :  { %v3035_v14 = vpop.eup %3034 }
 0x658   :  { %v1427_v20 = vmul.f32 %v3035_v14, %v3033_v13 }
 0x65a   :  { %1493 = vmatmul.mubr.f32.vlgmr.msra.gmra.mrb[12].mxu0 %v1427_v20  ;;  %1564 = vmatmul.mubr.f32.vlgmr.msra.gmra.mrb[12].mxu1 %v1427_v20  ;;  %v1940_v20 = vld [vmem:[#allocation4 + $0x80] sm:$0xff] }
 0x65b   :  { %2750 = vmatpush1.bf16.msra.mxu0 %v3203_v22  ;;  %2782 = vmatpush1.bf16.msra.mxu1 %v3206_v25 }
 0x65c   :  { %2752 = vmatprep.subr.bf16.mxu0 %v3210_v29  ;;  %2784 = vmatprep.subr.bf16.mxu1 %v3217_v34 }
 0x65d   :  { %1662 = vmatprep.mubr.f32.mxu0 %v3132_v0  ;;  %1733 = vmatprep.mubr.f32.mxu1 %v3132_v0 }
 0x65f   :  { %2754 = vmatpush1.bf16.msra.mxu0 %v3219_v35  ;;  %2786 = vmatpush1.bf16.msra.mxu1 %v3223_v38 }
 0x660   :  { %2756 = vmatprep.subr.bf16.mxu0 %v3227_v42  ;;  %2788 = vmatprep.subr.bf16.mxu1 %v3234_v47 }
 0x663   :  { %2758 = vmatpush1.bf16.msra.mxu0 %v3238_v50  ;;  %2790 = vmatpush1.bf16.msra.mxu1 %v3242_v54 }
 0x664   :  { %2760 = vmatprep.subr.bf16.mxu0 %v3246_v58  ;;  %2792 = vmatprep.subr.bf16.mxu1 %v3250_v61 }
 0x667   :  { %2762 = vmatpush1.bf16.msra.mxu0 %v3257_v2  ;;  %2794 = vmatpush1.bf16.msra.mxu1 %v3261_v5 }
 0x668   :  { %2764 = vmatprep.subr.bf16.mxu0 %v3265_v8  ;;  %2796 = vmatprep.subr.bf16.mxu1 %v3269_v11 }
 0x66b   :  { %2766 = vmatpush1.bf16.msra.mxu0 %v3276_v15  ;;  %2798 = vmatpush1.bf16.msra.mxu1 %v3280_v19 }
 0x66c   :  { %2768 = vmatprep.subr.bf16.mxu0 %v3284_v24  ;;  %2800 = vmatprep.subr.bf16.mxu1 %v3288_v28 }
 0x66f   :  { %2770 = vmatpush1.bf16.msra.mxu0 %v3295_v33  ;;  %2802 = vmatpush1.bf16.msra.mxu1 %v3299_v39 }
 0x670   :  { %2772 = vmatprep.subr.bf16.mxu0 %v3303_v43  ;;  %2804 = vmatprep.subr.bf16.mxu1 %v3307_v46 }
 0x673   :  { %2774 = vmatpush1.bf16.msra.mxu0 %v3314_v52  ;;  %2806 = vmatpush1.bf16.msra.mxu1 %v3318_v56 }
 0x674   :  { %2776 = vmatprep.subr.bf16.mxu0 %v3322_v60  ;;  %2808 = vmatprep.subr.bf16.mxu1 %v3326_v1  ;;  %v1768_v60 = vld [vmem:[%s3699_s5] sm:$0xff] }
 0x677   :  { %2778 = vmatpush1.bf16.msra.mxu0 %v3333_v4  ;;  %2810 = vmatpush1.bf16.msra.mxu1 %v3337_v6 }
 0x678   :  { %2246 = vmatprep.subr.mxu0 %v3132_v0  ;;  %2251 = vmatprep.subr.mxu1 %v3132_v0 }
 0x72d   :  { %v1494_v22 = vpop.f32.mrb[12].mxu0  ;;  %v1565_v25 = vpop.f32.mrb[12].mxu1 }
 0x72e   :  { %v2879_v29 = vadd.f32 %v1494_v22, %v3391_v16  ;;  %v1496_v34 = vpop.f32.mrb[13].mxu0  ;;  %v1567_v35 = vpop.f32.mrb[13].mxu1  ;;  %v2895_v50 = vadd.f32 %v1565_v25, %v3397_v37  ;;  %v1941_v22 = vld [vmem:[#allocation4 + $0x88] sm:$0xff]  ;;  %v1924_v25 = vld [vmem:[#allocation4] sm:$0xff] }
 0x72f   :  { %v2880_v38 = vadd.f32 %v1496_v34, %v3393_v18  ;;  %v2896_v54 = vadd.f32 %v1567_v35, %v3400_v45  ;;  %v1925_v34 = vld [vmem:[#allocation4 + $0x8] sm:$0xff]  ;;  %v1942_v35 = vld [vmem:[#allocation4 + $0x90] sm:$0xff] }
 0x730   :  { %v2181_v42 = vmul.f32 -1.442695, %v2879_v29  ;;  %v2183_v58 = vmul.f32 -1.442695, %v2895_v50  ;;  %v2811_v29 = vpack.c.bf16 %v1941_v22, %v1940_v20  ;;  %v1926_v50 = vld [vmem:[#allocation4 + $0x10] sm:$0xff]  ;;  %v2040_v20 = vld [vmem:[#allocation4 + $0x138] sm:$0xff] }
 0x731   :  { %v2182_v47 = vmul.f32 -1.442695, %v2880_v38  ;;  %v1943_v38 = vld [vmem:[#allocation4 + $0x98] sm:$0xff] }
 0x732   :  { %3036 = vpow2.f32 %v2181_v42  ;;  %v2813_v42 = vpack.c.bf16 %v1925_v34, %v1924_v25  ;;  %v2042_v34 = vld [vmem:[#allocation4 + $0x148] sm:$0xff] }
 0x733   :  { %3038 = vpow2.f32 %v2182_v47  ;;  %v2815_v47 = vpack.c.bf16 %v1943_v38, %v1942_v35  ;;  %v2043_v38 = vld [vmem:[#allocation4 + $0x150] sm:$0xff] }
 0x734   :  { %3040 = vtanh.f32 %v2896_v54  ;;  %v1927_v54 = vld [vmem:[#allocation4 + $0x18] sm:$0xff] }
 0x735   :  { %3042 = vpow2.f32 %v2183_v58  ;;  %v1944_v58 = vld [vmem:[#allocation4 + $0xa0] sm:$0xff] }
 0x73c   :  { %v3037_v61 = vpop.eup %3036 }
 0x73d   :  { %v1583_v2 = vadd.f32 1.0, %v3037_v61  ;;  %v3039_v5 = vpop.eup %3038  ;;  %v1945_v61 = vld [vmem:[#allocation4 + $0xa8] sm:$0xff] }
 0x73e   :  { %v1584_v8 = vadd.f32 1.0, %v3039_v5  ;;  %v3041_v11 = vpop.eup %3040  ;;  %v2819_v5 = vpack.c.bf16 %v1945_v61, %v1944_v58  ;;  %v2047_v61 = vld [vmem:[#allocation4 + $0x170] sm:$0xff] }
 0x73f   :  { %3044 = vrcp.f32 %v1583_v2  ;;  %v3043_v15 = vpop.eup %3042  ;;  %v2817_v2 = vpack.c.bf16 %v1927_v54, %v1926_v50  ;;  %v2045_v50 = vld [vmem:[#allocation4 + $0x160] sm:$0xff]  ;;  %v2046_v54 = vld [vmem:[#allocation4 + $0x168] sm:$0xff] }
 0x740   :  { %3046 = vrcp.f32 %v1584_v8  ;;  %v1585_v33 = vadd.f32 1.0, %v3043_v15  ;;  %v1928_v8 = vld [vmem:[#allocation4 + $0x20] sm:$0xff]  ;;  %v1946_v15 = vld [vmem:[#allocation4 + $0xb0] sm:$0xff]  ;;  %v2862_v58 = vpack.c.bf16 %v2046_v54, %v2045_v50 }
 0x742   :  { %3048 = vrcp.f32 %v1585_v33  ;;  %v1930_v33 = vld [vmem:[#allocation4 + $0x30] sm:$0xff] }
 0x749   :  { %v3045_v19 = vpop.eup %3044 }
 0x74a   :  { %v1594_v24 = vmul.f32 %v3045_v19, %v3041_v11  ;;  %v3047_v28 = vpop.eup %3046  ;;  %v1929_v11 = vld [vmem:[#allocation4 + $0x28] sm:$0xff]  ;;  %v1947_v19 = vld [vmem:[#allocation4 + $0xb8] sm:$0xff] }
 0x74b   :  { %v1593_v39 = vmul.f32 %v3047_v28, %v3616_v12  ;;  %v2823_v28 = vpack.c.bf16 %v1947_v19, %v1946_v15 }
 0x74c   :  { %v3049_v46 = vpop.eup %3048 }
 0x74d   :  { %v1595_v43 = vadd.f32 %v1594_v24, %v1593_v39  ;;  %v2821_v24 = vpack.c.bf16 %v1929_v11, %v1928_v8  ;;  %v1931_v39 = vld [vmem:[#allocation4 + $0x38] sm:$0xff]  ;;  %v2188_v11 = vld [vmem:[%s3698_s4 + $0x4] ss:$0 sm:$0xff] }
 0x74f   :  { %3050 = vtanh.f32 %v1595_v43 }
 0x759   :  { %v3051_v52 = vpop.eup %3050 }
 0x75a   :  { %v1597_v56 = vmul.f32 %v3051_v52, %v3049_v46  ;;  %v1949_v46 = vld [vmem:[#allocation4 + $0xc8] sm:$0xff]  ;;  %v2825_v52 = vpack.c.bf16 %v1931_v39, %v1930_v33  ;;  %v2126_v33 = vand.u32 127, %v135_v9  ;;  %v2189_v39 = vld [vmem:[%s3698_s4 + $0x5] ss:$0 sm:$0xff] }
 0x75c   :  { %1663 = vmatmul.mubr.f32.vlgmr.msra.gmra.mrb[14].mxu0 %v1597_v56  ;;  %1734 = vmatmul.mubr.f32.vlgmr.msra.gmra.mrb[14].mxu1 %v1597_v56  ;;  %vm2127_vm3 = vcmp.lt.s32.totalorder %v2126_v33, 10 }
 0x75d   :  { %2247 = vmatpush3.xpose.msra.mxu0 %v1768_v60  ;;  %2248 = vmatprep.mubr.msk.f32.mxu0 %vm3133_vm1, %v3132_v0 }
 0x75e   :  { %2252 = vmatpush3.msra.mxu1 %v1768_v60  ;;  %2253 = vmatprep.mubr.msk.f32.mxu1 %vm3133_vm1, %v3132_v0  ;;  %v1932_v60 = vld [vmem:[#allocation4 + $0x40] sm:$0xff] }
 0x75f   :  { %2812 = vmatprep.subr.bf16.mxu0 %v2811_v29  ;;  %v2041_v29 = vld [vmem:[#allocation4 + $0x140] sm:$0xff] }
 0x760   :  { %v2856_v35 = vpack.c.bf16 %v2042_v34, %v2041_v29 }
 0x82f   :  { %v1664_v1 = vpop.f32.mrb[14].mxu0  ;;  %v1735_v4 = vpop.f32.mrb[14].mxu1 }
 0x830   :  { %v2881_v6 = vadd.f32 %v1664_v1, %v3391_v16  ;;  %v1666_v27 = vpop.f32.mrb[15].mxu0  ;;  %v1737_v23 = vpop.f32.mrb[15].mxu1  ;;  %v2897_v32 = vadd.f32 %v1735_v4, %v3397_v37  ;;  %v1933_v1 = vld [vmem:[#allocation4 + $0x48] sm:$0xff]  ;;  %v1950_v4 = vld [vmem:[#allocation4 + $0xd0] sm:$0xff] }
 0x831   :  { %v2882_v26 = vadd.f32 %v1666_v27, %v3393_v18  ;;  %v2898_v36 = vadd.f32 %v1737_v23, %v3400_v45  ;;  %v2829_v27 = vpack.c.bf16 %v1933_v1, %v1932_v60 }
 0x832   :  { %v2184_v30 = vmul.f32 -1.442695, %v2881_v6  ;;  %v2186_v40 = vmul.f32 -1.442695, %v2897_v32  ;;  %v1951_v6 = vld [vmem:[#allocation4 + $0xd8] sm:$0xff]  ;;  %v1953_v32 = vld [vmem:[#allocation4 + $0xe8] sm:$0xff] }
 0x833   :  { %v2185_v31 = vmul.f32 -1.442695, %v2882_v26  ;;  %v2831_v23 = vpack.c.bf16 %v1951_v6, %v1950_v4  ;;  %v1934_v26 = vld [vmem:[#allocation4 + $0x50] sm:$0xff] }
 0x834   :  { %3052 = vpow2.f32 %v2184_v30  ;;  %v1935_v30 = vld [vmem:[#allocation4 + $0x58] sm:$0xff] }
 0x835   :  { %3054 = vpow2.f32 %v2185_v31  ;;  %v1952_v31 = vld [vmem:[#allocation4 + $0xe0] sm:$0xff] }
 0x836   :  { %3056 = vtanh.f32 %v2898_v36  ;;  %v2833_v36 = vpack.c.bf16 %v1935_v30, %v1934_v26 }
 0x837   :  { %3058 = vpow2.f32 %v2186_v40  ;;  %v2835_v40 = vpack.c.bf16 %v1953_v32, %v1952_v31 }
 0x83e   :  { %v3053_v41 = vpop.eup %3052 }
 0x83f   :  { %v1753_v44 = vadd.f32 1.0, %v3053_v41  ;;  %v3055_v48 = vpop.eup %3054  ;;  %v1936_v41 = vld [vmem:[#allocation4 + $0x60] sm:$0xff] }
 0x840   :  { %v1754_v16 = vadd.f32 1.0, %v3055_v48  ;;  %v3057_v49 = vpop.eup %3056  ;;  %v1954_v48 = vld [vmem:[#allocation4 + $0xf0] sm:$0xff] }
 0x841   :  { %3060 = vrcp.f32 %v1753_v44  ;;  %v3059_v51 = vpop.eup %3058  ;;  %v1937_v44 = vld [vmem:[#allocation4 + $0x68] sm:$0xff] }
 0x842   :  { %3062 = vrcp.f32 %v1754_v16  ;;  %v1755_v21 = vadd.f32 1.0, %v3059_v51  ;;  %v1955_v16 = vld [vmem:[#allocation4 + $0xf8] sm:$0xff] }
 0x843   :  { %v2839_v51 = vpack.c.bf16 %v1955_v16, %v1954_v48 }
 0x844   :  { %3064 = vrcp.f32 %v1755_v21 }
 0x84b   :  { %v3061_v18 = vpop.eup %3060 }
 0x84c   :  { %v1764_v17 = vmul.f32 %v3061_v18, %v3057_v49  ;;  %v3063_v53 = vpop.eup %3062  ;;  %v2837_v49 = vpack.c.bf16 %v1937_v44, %v1936_v41  ;;  %v1938_v18 = vld [vmem:[#allocation4 + $0x70] sm:$0xff] }
 0x84d   :  { %v1763_v55 = vmul.f32 %v3063_v53, %v1595_v43  ;;  %v1948_v43 = vld [vmem:[#allocation4 + $0xc0] sm:$0xff] }
 0x84e   :  { %v3065_v37 = vpop.eup %3064  ;;  %v2827_v56 = vpack.c.bf16 %v1949_v46, %v1948_v43 }
 0x84f   :  { %v1765_v57 = vadd.f32 %v1764_v17, %v1763_v55  ;;  %v1939_v17 = vld [vmem:[#allocation4 + $0x78] sm:$0xff] }
 0x850   :  { %v2841_v53 = vpack.c.bf16 %v1939_v17, %v1938_v18 }
 0x851   :  { %3066 = vtanh.f32 %v1765_v57  ;;  %2140 = vst [vmem:[%s3700_s6 + $0x10] sm:$0xff] %v1765_v57 }
 0x85b   :  { %v3067_v45 = vpop.eup %3066 }
 0x85c   :  { %v1767_v59 = vmul.f32 %v3067_v45, %v3065_v37  ;;  %v2033_v37 = vld [vmem:[#allocation4 + $0x100] sm:$0xff]  ;;  %v2034_v45 = vld [vmem:[#allocation4 + $0x108] sm:$0xff] }
 0x85e   :  { %2249 = vmatmul.mubr.f32.vlgmr.msra.gmra.mrb[16].mxu0 %v1767_v59  ;;  %2139 = vst [vmem:[%s3700_s6 + $0x8] sm:$0xff] %v1767_v59 }
 0x85f   :  { %2026 = vmatprep.mubr.f32.mxu0 %v1767_v59  ;;  %2814 = vmatpush3.bf16.msra.mxu0 %v2813_v42  ;;  %v2035_v59 = vld [vmem:[#allocation4 + $0x110] sm:$0xff]  ;;  %v2044_v42 = vld [vmem:[#allocation4 + $0x158] sm:$0xff] }
 0x860   :  { %2816 = vmatprep.subr.bf16.mxu0 %v2815_v47  ;;  %v2859_v47 = vpack.c.bf16 %v2044_v42, %v2043_v38 }
 0x863   :  { %2818 = vmatpush3.bf16.msra.mxu0 %v2817_v2  ;;  %v2048_v2 = vld [vmem:[#allocation4 + $0x178] sm:$0xff] }
 0x864   :  { %2820 = vmatprep.subr.bf16.mxu0 %v2819_v5  ;;  %v2865_v5 = vpack.c.bf16 %v2048_v2, %v2047_v61 }
 0x867   :  { %2822 = vmatpush3.bf16.msra.mxu0 %v2821_v24 }
 0x868   :  { %2824 = vmatprep.subr.bf16.mxu0 %v2823_v28 }
 0x86b   :  { %2826 = vmatpush3.bf16.msra.mxu0 %v2825_v52 }
 0x86c   :  { %2828 = vmatprep.subr.bf16.mxu0 %v2827_v56 }
 0x86f   :  { %2830 = vmatpush3.bf16.msra.mxu0 %v2829_v27 }
 0x870   :  { %2832 = vmatprep.subr.bf16.mxu0 %v2831_v23 }
 0x873   :  { %2834 = vmatpush3.bf16.msra.mxu0 %v2833_v36 }
 0x874   :  { %2836 = vmatprep.subr.bf16.mxu0 %v2835_v40 }
 0x877   :  { %2838 = vmatpush3.bf16.msra.mxu0 %v2837_v49 }
 0x878   :  { %2840 = vmatprep.subr.bf16.mxu0 %v2839_v51 }
 0x87b   :  { %2842 = vmatpush3.bf16.msra.mxu0 %v2841_v53 }
 0x931   :  { %v1835_v62 = vpop.f32.mrb[16].mxu0 }
 0x932   :  { %v2250_v63 = vpop.f32.mrb[17].mxu0  ;;  %v1840_v3 = vsel %vm1839_vm2, %v1835_v62, -inf }
 0x933   :  { %1841 = vmax.xlane.f32.xlu0 %v1840_v3  ;;  %v2844_v63 = vpack.c.bf16 %v2034_v45, %v2033_v37  ;;  %v2036_v3 = vld [vmem:[#allocation4 + $0x118] sm:$0xff] }
 0x9c0   :  { %v1842_v7 = vpop.xlane.xlu0 %1841 }
 0x9c1   :  { %v1843_v10 = vsub.f32 %v1835_v62, %v1842_v7  ;;  %v3134_v62 = vmov 0.0|0.0   ;;  %v2847_v7 = vpack.c.bf16 %v2036_v3, %v2035_v59 }
 0x9c2   :  { %2843 = vmatprep.subr.bf16.mxu1 %v3134_v62 }
 0x9c3   :  { %v1844_v12 = vmul.f32 1.442695, %v1843_v10  ;;  %v2037_v10 = vld [vmem:[#allocation4 + $0x120] sm:$0xff] }
 0x9c5   :  { %3068 = vpow2.f32 %v1844_v12  ;;  %v2038_v12 = vld [vmem:[#allocation4 + $0x128] sm:$0xff] }
 0x9cf   :  { %v3676_v13 = vpop.eup %3068 }
 0x9d0   :  { %v1846_v14 = vsel %vm1839_vm2, %v3676_v13, 0.0 }
 0x9d1   :  { %1847 = vadd.xlane.f32.xlu0 %v1846_v14  ;;  %v2850_v14 = vpack.c.bf16 %v2038_v12, %v2037_v10 }
 0xa5e   :  { %v1848_v21 = vpop.xlane.xlu0 %1847 }
 0xa5f   :  { %3070 = vrcp.f32 %v1848_v21 }
 0xa69   :  { %v3071_v55 = vpop.eup %3070 }
 0xa6a   :  { %v1850_v57 = vmul.f32 %v3071_v55, %v3676_v13  ;;  %v2039_v13 = vld [vmem:[#allocation4 + $0x130] sm:$0xff] }
 0xa6b   :  { %v2853_v22 = vpack.c.bf16 %v2040_v20, %v2039_v13 }
 0xa6c   :  { %2254 = vmatmul.mubr.msk.f32.vlgmr.msra.gmra.mrb[16].mxu1 %vm1839_vm2, %v1850_v57 }
 0xa6d   :  { %2288 = vmatprep.mubr.msk.f32.mxu1 %vm3133_vm1, %v3132_v0  ;;  %2845 = vmatpush3.bf16.msra.mxu1 %v2844_v63 }
 0xa6e   :  { %2846 = vmatprep.subr.bf16.mxu1 %v3134_v62 }
 0xa71   :  { %2848 = vmatpush3.bf16.msra.mxu1 %v2847_v7 }
 0xa72   :  { %2849 = vmatprep.subr.bf16.mxu1 %v3134_v62 }
 0xa75   :  { %2851 = vmatpush3.bf16.msra.mxu1 %v2850_v14 }
 0xa76   :  { %2852 = vmatprep.subr.bf16.mxu1 %v3134_v62 }
 0xa79   :  { %2854 = vmatpush3.bf16.msra.mxu1 %v2853_v22 }
 0xa7a   :  { %2855 = vmatprep.subr.bf16.mxu1 %v3134_v62 }
 0xa7d   :  { %2857 = vmatpush3.bf16.msra.mxu1 %v2856_v35 }
 0xa7e   :  { %2858 = vmatprep.subr.bf16.mxu1 %v3134_v62 }
 0xa81   :  { %2860 = vmatpush3.bf16.msra.mxu1 %v2859_v47 }
 0xa82   :  { %2861 = vmatprep.subr.bf16.mxu1 %v3134_v62 }
 0xa85   :  { %2863 = vmatpush3.bf16.msra.mxu1 %v2862_v58 }
 0xa86   :  { %2864 = vmatprep.subr.bf16.mxu1 %v3134_v62 }
 0xa89   :  { %2866 = vmatpush3.bf16.msra.mxu1 %v2865_v5 }
 0xb3f   :  { %v1920_v0 = vpop.f32.mrb[16].mxu1 }
 0xb40   :  { %v2255_v25 = vpop.f32.mrb[17].mxu1  ;;  %2027 = vmatmul.mubr.f32.vlgmr.msra.gmra.mrb[18].mxu0 %v1920_v0 }
 0xc13   :  { %v2226_v8 = vpop.f32.mrb[18].mxu0 }
 0xc14   :  { %v2227_v15 = vpop.f32.mrb[19].mxu0 }
 0xc15   :  { %v2228_v19 = vadd.f32 %v2227_v15, %v2226_v8 }
 0xc17   :  { %v2029_v24 = vadd.f32 %v2228_v19, %v2188_v11 }
 0xc19   :  { %3072 = vtanh.f32 %v2029_v24 }
 0xc23   :  { %v3073_v28 = vpop.eup %3072 }
 0xc24   :  { %2289 = vmatmul.mubr.f32.vlgmr.msra.gmra.mrb[18].mxu1 %v3073_v28 }
 0xcf7   :  { %v2121_v43 = vpop.f32.mrb[18].mxu1 }
 0xcf8   :  { %v2122_v46 = vadd.f32 %v2189_v39, %v2121_v43  ;;  %v2290_v52 = vpop.f32.mrb[19].mxu1 }
 0xcfa   :  { %v2128_v56 = vsel %vm2127_vm3, %v2122_v46, -1e+30 }
 0xcfb   :  { %2129 = vmax.xlane.f32.xlu1 %v2128_v56 }
 0xd88   :  { %v2130_v60 = vpop.xlane.xlu1 %2129 }
 0xd89   :  { %v2131_v1 = vsub.f32 %v2128_v56, %v2130_v60 }
 0xd8b   :  { %v2132_v4 = vmul.f32 1.442695, %v2131_v1 }
 0xd8d   :  { %3074 = vpow2.f32 %v2132_v4 }
 0xd97   :  { %v3075_v6 = vpop.eup %3074 }
 0xd98   :  { %2134 = vadd.xlane.f32.xlu1 %v3075_v6 }
 0xe25   :  { %v2135_v27 = vpop.xlane.xlu1 %2134 }
 0xe26   :  { %3076 = vrcp.f32 %v2135_v27 }
 0xe30   :  { %v3077_v23 = vpop.eup %3076 }
 0xe31   :  { %v2137_v9 = vmul.f32 %v3077_v23, %v3075_v6 }
 0xe33   :  { %2138 = vst [vmem:[%s3700_s6] sm:$0xff] %v2137_v9 }
 0xe34   :  { %2145 = vsyncpa [#allocation3], 1 }
 0xe35   :  { %2146 = vsyncpa [#allocation5], 1 }

</bundles_post_ra>
